<compile_context>
chip_gen: v7x
topology: tpu7x:2x2x1
jax: 0.10.0
libtpu: 0.0.40
codegen_flags: <defaults>
</compile_context>

<pallas_src>
import functools

import jax
import jax.numpy as jnp
from jax.experimental import pallas as pl
from jax.experimental.pallas import tpu as pltpu


def _round_up(a, b):
    return -(-a // b) * b


def _vmem_capacity_bytes():
    """Physical VMEM of the local TPU; conservative fallback if unqueryable."""
    try:
        info = pltpu.get_tpu_info()
        for name in ("vmem_capacity_bytes", "vmem_bytes", "vmem_size_bytes"):
            v = getattr(info, name, None)
            if v:
                return int(v)
    except Exception:
        pass
    return 64 * 1024 * 1024  # v7x-sized (smallest current chip) => safe everywhere


def _decoder_kernel(x_ref, w1t_ref, b1_ref, w2r_ref, b2t_ref, o_ref, hext_ref,
                    *, T, J, HALO, mask_from_tile, precision):
    # x_ref:   (1, Tt, C_in)      input tile, channels-last, compute dtype
    # w1t_ref: (C_in, C_in)       1x1 conv weight (transposed), compute dtype
    # b1_ref:  (1, C_in)          f32
    # w2r_ref: (C_in, J*SC_pad)   transposed-conv weight, per-j blocks, compute dtype
    # b2t_ref: (1, SC_pad)        f32, s-major tiled bias (padded lanes = 0)
    # o_ref:   (1, Tt, SC_pad)    output frames
    # hext_ref:(HALO+Tt, C_in)    compute-dtype scratch; rows [HALO-(J-1), HALO)
    #                             carry the previous tile's h tail, rows
    #                             [HALO, HALO+Tt) hold the current tile's h.
    i = pl.program_id(1)
    Tt = x_ref.shape[1]
    C_in = x_ref.shape[2]
    SC_pad = o_ref.shape[2]
    Jm1 = J - 1
    cdt = hext_ref.dtype

    # ---- 1x1 Conv1d + ReLU (f32 accumulation on the MXU) ----
    h = jnp.dot(x_ref[0], w1t_ref[...], preferred_element_type=jnp.float32,
                precision=precision)
    h = jnp.maximum(h + b1_ref[...], 0.0)                      # (Tt, C_in) f32

    # ---- halo carry: previous tile's last J-1 h rows parked just below the
    #      aligned h slab. ----
    if Jm1 > 0:
        @pl.when(i == 0)
        def _():
            hext_ref[HALO - Jm1:HALO, :] = jnp.zeros((Jm1, C_in), cdt)

        @pl.when(i > 0)
        def _():
            # previous tile's h occupies rows [HALO, HALO+Tt); copy its tail
            # before overwriting with the current tile's h.
            hext_ref[HALO - Jm1:HALO, :] = hext_ref[HALO + Tt - Jm1:HALO + Tt, :]

    # sublane/packing-aligned store (HALO is a multiple of 16).
    hext_ref[HALO:HALO + Tt, :] = h.astype(cdt)

    # Rows from the zero-padded time tail (global t >= T) must be exactly zero
    # or relu(b1) would leak into valid output frames.  Only tiles that
    # actually contain padded rows pay for the mask.
    if mask_from_tile is not None:
        @pl.when(i >= mask_from_tile)
        def _():
            row = i * Tt + jax.lax.broadcasted_iota(jnp.int32, (Tt, 1), 0)
            cur = hext_ref[HALO:HALO + Tt, :]
            hext_ref[HALO:HALO + Tt, :] = jnp.where(row < T, cur,
                                                    jnp.zeros_like(cur))

    # ---- ConvTranspose1d: J accumulating matmuls; the overlap-add happens in
    #      the f32 accumulator (no (Tt+J-1, J*SC_pad) intermediate slab). ----
    # local out frame r = sum_d h_ext[r + d] @ W2_block(J-1-d)
    acc = None
    for d in range(J):                                         # J = ceil(K/S), small
        lhs = hext_ref[HALO - Jm1 + d:HALO - Jm1 + d + Tt, :]   # (Tt, C_in)
        rhs = w2r_ref[:, (Jm1 - d) * SC_pad:(J - d) * SC_pad]   # (C_in, SC_pad)
        part = jnp.dot(lhs, rhs, preferred_element_type=jnp.float32,
                       precision=precision)
        acc = part if acc is None else acc + part

    # bias + trailing ReLU, single lane-dense store.
    o_ref[0] = jnp.maximum(acc + b2t_ref[...], 0.0).astype(o_ref.dtype)


def demucs_decoder(x_nct, w1, b1, w2, b2, stride, *,
                   compute_dtype=jnp.bfloat16, out_dtype=jnp.float32,
                   t_tile=None, precision=None, channels_last=False):
    """
    x_nct: (N, C_in, T)      PyTorch Conv1d layout
    w1:    (C_in, C_in)      1x1 Conv1d weight (kernel dim squeezed)
    b1:    (C_in,)
    w2:    (C_in, C_out, K)  ConvTranspose1d weight (PyTorch layout)
    b2:    (C_out,)
    Returns (N, C_out, L_out) with L_out = (T-1)*stride + K, or
    (N, L_out, C_out) when channels_last=True (skips the transpose round trip).
    """
    N, C_in, T = x_nct.shape
    C_out, K = w2.shape[1], w2.shape[2]
    S = stride
    J = -(-K // S)                      # number of overlapping frames
    Jm1 = J - 1
    SC = S * C_out
    # TODO(synk): for layers where S*C_out << 128, pack several consecutive
    # output frames per row instead of padding each frame to 128 lanes.
    SC_pad = _round_up(SC, 128)         # lane-dense output frame width
    Q = T + J - 1                       # number of output frame rows carrying data
    L_out = (T - 1) * S + K
    HALO = _round_up(Jm1, 16) if Jm1 > 0 else 0   # aligned slot for h in scratch

    cdt_size = jnp.dtype(compute_dtype).itemsize
    out_size = jnp.dtype(out_dtype).itemsize

    # --- VMEM-aware tile sizing (v5e/v6e: 128 MiB phys -> ~96 MiB budget,
    #     v7x: 64 MiB phys -> ~48 MiB budget). ---
    vmem_budget = max(32 * 1024 * 1024, (_vmem_capacity_bytes() * 3) // 4)

    def tile_bytes(tt):
        io = 2 * tt * C_in * cdt_size + 2 * tt * SC_pad * out_size        # dbl-buf
        weights = (C_in * C_in + C_in * J * SC_pad) * cdt_size \
            + (C_in + SC_pad) * 4                                         # single-buf
        scratch = (HALO + tt) * C_in * cdt_size
        live = tt * SC_pad * 4 + tt * C_in * 4                            # f32 acc + h
        return io + weights + scratch + live

    if t_tile is None:
        t_tile = 8
        cand = min(1024, _round_up(Q, 8))
        while cand >= 8:
            if tile_bytes(cand) <= vmem_budget:
                t_tile = cand
                break
            cand -= 8
    Tt = max(_round_up(max(t_tile, 8), 8), _round_up(max(Jm1, 1), 8))
    assert Tt >= Jm1, "T tile must cover the transposed-conv halo"
    nt = -(-Q // Tt)
    T_pad = nt * Tt

    # --- parameter / layout plumbing (plain JAX glue, fused by XLA) ---
    x_ntc = jnp.transpose(x_nct, (0, 2, 1))                            # (N, T, C_in)
    x_ntc = jnp.pad(x_ntc, ((0, 0), (0, T_pad - T), (0, 0))).astype(compute_dtype)
    w1t = jnp.transpose(w1, (1, 0)).astype(compute_dtype)              # (C_in, C_in)
    b1r = b1.reshape(1, C_in).astype(jnp.float32)
    # (C_in, C_out, K) -> (C_in, K, C_out), pad K -> J*S, split into J blocks
    # of width S*C_out, pad each block's lanes to SC_pad, flatten.
    w2p = jnp.transpose(w2, (0, 2, 1))
    w2p = jnp.pad(w2p, ((0, 0), (0, J * S - K), (0, 0)))
    w2p = w2p.reshape(C_in, J, SC)
    w2p = jnp.pad(w2p, ((0, 0), (0, 0), (0, SC_pad - SC)))
    w2r = w2p.reshape(C_in, J * SC_pad).astype(compute_dtype)
    b2t = jnp.pad(jnp.tile(b2, S), (0, SC_pad - SC)).reshape(1, SC_pad)
    b2t = b2t.astype(jnp.float32)

    kernel = functools.partial(
        _decoder_kernel, T=T, J=J, HALO=HALO,
        mask_from_tile=(T // Tt) if T_pad > T else None, precision=precision)

    cost = pl.CostEstimate(
        flops=int(2 * N * T_pad * C_in * C_in
                  + 2 * N * T_pad * C_in * J * SC_pad),
        transcendentals=0,
        bytes_accessed=int(N * T_pad * C_in * cdt_size
                           + (C_in * C_in + C_in * J * SC_pad) * cdt_size
                           + N * T_pad * SC_pad * out_size))

    def build_call(single_buffer_weights):
        if single_buffer_weights:
            def const_spec(shape):
                return pl.BlockSpec(shape, lambda n, i: (0,) * len(shape),
                                    pipeline_mode=pl.Buffered(buffer_count=1))
        else:
            def const_spec(shape):
                return pl.BlockSpec(shape, lambda n, i: (0,) * len(shape))
        return pl.pallas_call(
            kernel,
            out_shape=jax.ShapeDtypeStruct((N, T_pad, SC_pad), out_dtype),
            grid_spec=pltpu.PrefetchScalarGridSpec(
                num_scalar_prefetch=0,
                grid=(N, nt),
                in_specs=[
                    pl.BlockSpec((1, Tt, C_in), lambda n, i: (n, i, 0)),
                    const_spec((C_in, C_in)),
                    const_spec((1, C_in)),
                    const_spec((C_in, J * SC_pad)),
                    const_spec((1, SC_pad)),
                ],
                out_specs=pl.BlockSpec((1, Tt, SC_pad), lambda n, i: (n, i, 0)),
                # compute-dtype halo carry + staging for the current tile's h.
                scratch_shapes=[pltpu.VMEM((HALO + Tt, C_in), compute_dtype)],
            ),
            compiler_params=pltpu.CompilerParams(
                # N is independent (megacore / dual-TC parallel); the T-tile
                # axis carries the halo sequentially and must stay "arbitrary".
                # TODO(synk): batch-1 on v7x leaves one TensorCore idle; an
                # output-column parallel grid axis would recover it.
                dimension_semantics=("parallel", "arbitrary"),
                vmem_limit_bytes=int(vmem_budget),
            ),
            cost_estimate=cost,
        )

    try:
        out_frames = build_call(True)(x_ntc, w1t, b1r, w2r, b2t)
    except Exception:
        # Fallback if this jax/libtpu build rejects single-buffered
        # (pl.Buffered(1)) grid-invariant operands.
        out_frames = build_call(False)(x_ntc, w1t, b1r, w2r, b2t)

    # glue: (N, T_pad, SC_pad) -> valid frames/lanes -> (N, Q*S, C_out).
    # TODO(synk): a fused channels-last consumer could read out_frames directly
    # (keeping the [:Q] trim) and skip this slice/reshape entirely.
    out = out_frames[:, :Q, :SC].reshape(N, Q * S, C_out)
    if channels_last:
        return out[:, :L_out, :]
    # PyTorch layout (N, C_out, L_out): one extra HBM round trip.
    return jnp.transpose(out, (0, 2, 1))[:, :, :L_out]


def reference(x_nct, w1, b1, w2, b2, stride):
    """Pure-JAX reference matching PyTorch semantics."""
    h = jnp.einsum('oi,nit->not', w1, x_nct) + b1[None, :, None]
    h = jnp.maximum(h, 0.0)
    N, C_in, T = x_nct.shape
    C_out, K = w2.shape[1], w2.shape[2]
    L = (T - 1) * stride + K
    out = jnp.zeros((N, C_out, L), jnp.float32)
    for k in range(K):
        contrib = jnp.einsum('nit,ic->nct', h, w2[:, :, k])
        out = out.at[:, :, k: k + (T - 1) * stride + 1: stride].add(contrib)
    out = out + b2[None, :, None]
    return jnp.maximum(out, 0.0)


if __name__ == "__main__":
    key = jax.random.PRNGKey(0)

    def make_case(k, N, C_in, C_out, K, S, T):
        k1, k2, k3, k4, k5 = jax.random.split(k, 5)
        x = jax.random.normal(k1, (N, C_in, T), jnp.float32)
        w1 = jax.random.normal(k2, (C_in, C_in), jnp.float32) / jnp.sqrt(C_in)
        b1 = jax.random.normal(k3, (C_in,), jnp.float32) * 0.1
        w2 = jax.random.normal(k4, (C_in, C_out, K), jnp.float32) / jnp.sqrt(C_in * K)
        b2 = jax.random.normal(k5, (C_out,), jnp.float32) * 0.1
        return x, w1, b1, w2, b2

    ka, kb = jax.random.split(key)
    hi = jax.lax.Precision.HIGHEST

    # ---- Case A: DEMUCS-like config (J=2), multi-tile halo carry. ----
    N, C_in, C_out, K, S, T = 2, 16, 8, 8, 4, 16
    x, w1, b1, w2, b2 = make_case(ka, N, C_in, C_out, K, S, T)
    ref = reference(x, w1, b1, w2, b2, S)
    L_out = (T - 1) * S + K

    # f32 compute, strict precision, tiny T tile (exercises the halo carry).
    out32 = jax.block_until_ready(
        demucs_decoder(x, w1, b1, w2, b2, S, compute_dtype=jnp.float32,
                       t_tile=8, precision=hi))
    assert out32.shape == (N, C_out, L_out), out32.shape
    assert jnp.allclose(out32, ref, atol=1e-4, rtol=1e-4), \
        float(jnp.max(jnp.abs(out32 - ref)))

    # channels-last output (no post-kernel transpose round trip).
    out_cl = jax.block_until_ready(
        demucs_decoder(x, w1, b1, w2, b2, S, compute_dtype=jnp.float32,
                       t_tile=8, precision=hi, channels_last=True))
    assert out_cl.shape == (N, L_out, C_out), out_cl.shape
    assert jnp.allclose(out_cl, jnp.transpose(ref, (0, 2, 1)),
                        atol=1e-4, rtol=1e-4)

    # default bf16 compute path with VMEM-aware auto tile sizing.
    outbf = jax.block_until_ready(demucs_decoder(x, w1, b1, w2, b2, S))
    assert jnp.allclose(outbf, ref, atol=5e-2, rtol=5e-2), \
        float(jnp.max(jnp.abs(outbf - ref)))

    # bf16 output writeback (halves HBM traffic on the wide output).
    outbf16 = jax.block_until_ready(
        demucs_decoder(x, w1, b1, w2, b2, S, out_dtype=jnp.bfloat16))
    assert outbf16.dtype == jnp.bfloat16
    assert jnp.allclose(outbf16.astype(jnp.float32), ref, atol=1e-1, rtol=1e-1)

    # ---- Case B: larger halo (J=6, K not a multiple of S) with zero-padded
    #      rows spanning more than one T tile. ----
    N2, C_in2, C_out2, K2, S2, T2 = 1, 8, 4, 11, 2, 5
    x2, w12, b12, w22, b22 = make_case(kb, N2, C_in2, C_out2, K2, S2, T2)
    ref2 = reference(x2, w12, b12, w22, b22, S2)
    out2 = jax.block_until_ready(
        demucs_decoder(x2, w12, b12, w22, b22, S2, compute_dtype=jnp.float32,
                       t_tile=8, precision=hi))
    assert out2.shape == ref2.shape, (out2.shape, ref2.shape)
    assert jnp.allclose(out2, ref2, atol=1e-4, rtol=1e-4), \
        float(jnp.max(jnp.abs(out2 - ref2)))

    print("KERNEL_OK")
</pallas_src>

<mosaic_0001>
module attributes {stable_mosaic.version = 11 : i64} {
  func.func @_decoder_kernel(%arg0: i32, %arg1: i32, %arg2: memref<1x8x16xf32, #tpu.memory_space<vmem>>, %arg3: memref<16x16xf32, #tpu.memory_space<vmem>>, %arg4: memref<1x16xf32, #tpu.memory_space<vmem>>, %arg5: memref<16x256xf32, #tpu.memory_space<vmem>>, %arg6: memref<1x128xf32, #tpu.memory_space<vmem>>, %arg7: memref<1x8x128xf32, #tpu.memory_space<vmem>>, %arg8: memref<24x16xf32, #tpu.memory_space<vmem>>) attributes {dimension_semantics = [#tpu.dimension_semantics<parallel>, #tpu.dimension_semantics<arbitrary>], iteration_bounds = array<i64: 2, 3>, scalar_prefetch = 0 : i64, scratch_operands = 1 : i64, tpu.core_type = #tpu.core_type<tc>, window_params = [{transform_indices = @transform_0, window_bounds = array<i64: 1, 8, 16>}, {pipeline_mode = #tpu.pipeline_mode<synchronous>, transform_indices = @transform_1, window_bounds = array<i64: 16, 16>}, {pipeline_mode = #tpu.pipeline_mode<synchronous>, transform_indices = @transform_2, window_bounds = array<i64: 1, 16>}, {pipeline_mode = #tpu.pipeline_mode<synchronous>, transform_indices = @transform_3, window_bounds = array<i64: 16, 256>}, {pipeline_mode = #tpu.pipeline_mode<synchronous>, transform_indices = @transform_4, window_bounds = array<i64: 1, 128>}, {transform_indices = @transform_5, window_bounds = array<i64: 1, 8, 128>}]} {
    %c0 = arith.constant 0 : index
    %c0_0 = arith.constant 0 : index
    %c0_1 = arith.constant 0 : index
    %0 = vector.load %arg2[%c0, %c0_0, %c0_1] : memref<1x8x16xf32, #tpu.memory_space<vmem>>, vector<1x8x16xf32>
    %1 = vector.shape_cast %0 : vector<1x8x16xf32> to vector<8x16xf32>
    %c0_2 = arith.constant 0 : index
    %c0_3 = arith.constant 0 : index
    %2 = vector.load %arg3[%c0_2, %c0_3] : memref<16x16xf32, #tpu.memory_space<vmem>>, vector<16x16xf32>
    %cst = arith.constant dense<0.000000e+00> : vector<8x16xf32>
    %3 = tpu.matmul %1, %2, %cst {dimension_numbers = #tpu.dot_dimension_numbers<[1], [0], [0], [1], [0, 0, 1, 1], [], []>, precision = #tpu.contract_precision<fp32>} : vector<8x16xf32>, vector<16x16xf32>, vector<8x16xf32> -> vector<8x16xf32>
    %c0_4 = arith.constant 0 : index
    %c0_5 = arith.constant 0 : index
    %4 = vector.load %arg4[%c0_4, %c0_5] : memref<1x16xf32, #tpu.memory_space<vmem>>, vector<1x16xf32>
    %5 = vector.broadcast %4 : vector<1x16xf32> to vector<8x16xf32>
    %6 = arith.addf %3, %5 : vector<8x16xf32>
    %cst_6 = arith.constant 0.000000e+00 : f32
    %7 = vector.broadcast %cst_6 : f32 to vector<8x16xf32>
    %8 = arith.maximumf %6, %7 : vector<8x16xf32>
    %c0_i32 = arith.constant 0 : i32
    %9 = arith.cmpi eq, %arg1, %c0_i32 : i32
    %10 = arith.extui %9 : i1 to i32
    %c0_i32_7 = arith.constant 0 : i32
    %11 = arith.cmpi ne, %10, %c0_i32_7 : i32
    scf.if %11 {
      %cst_26 = arith.constant 0.000000e+00 : f32
      %34 = vector.broadcast %cst_26 : f32 to vector<1x16xf32>
      %c15_27 = arith.constant 15 : index
      %c0_28 = arith.constant 0 : index
      %35 = vector.load %arg8[%c15_27, %c0_28] : memref<24x16xf32, #tpu.memory_space<vmem>>, vector<1x16xf32>
      tpu.vector_store %arg8[%c15_27, %c0_28], %34 {strides = array<i32>} : memref<24x16xf32, #tpu.memory_space<vmem>>, vector<1x16xf32>,
    } else {
    }
    %c0_i32_8 = arith.constant 0 : i32
    %12 = arith.cmpi sgt, %arg1, %c0_i32_8 : i32
    %13 = arith.extui %12 : i1 to i32
    %c0_i32_9 = arith.constant 0 : i32
    %14 = arith.cmpi ne, %13, %c0_i32_9 : i32
    scf.if %14 {
      %c23 = arith.constant 23 : index
      %c0_26 = arith.constant 0 : index
      %34 = vector.load %arg8[%c23, %c0_26] : memref<24x16xf32, #tpu.memory_space<vmem>>, vector<1x16xf32>
      %c15_27 = arith.constant 15 : index
      %c0_28 = arith.constant 0 : index
      %35 = vector.load %arg8[%c15_27, %c0_28] : memref<24x16xf32, #tpu.memory_space<vmem>>, vector<1x16xf32>
      tpu.vector_store %arg8[%c15_27, %c0_28], %34 {strides = array<i32>} : memref<24x16xf32, #tpu.memory_space<vmem>>, vector<1x16xf32>,
    } else {
    }
    %c16 = arith.constant 16 : index
    %c0_10 = arith.constant 0 : index
    %15 = vector.load %arg8[%c16, %c0_10] : memref<24x16xf32, #tpu.memory_space<vmem>>, vector<8x16xf32>
    tpu.vector_store %arg8[%c16, %c0_10], %8 {strides = array<i32>} : memref<24x16xf32, #tpu.memory_space<vmem>>, vector<8x16xf32>,
    %c2_i32 = arith.constant 2 : i32
    %16 = arith.cmpi sge, %arg1, %c2_i32 : i32
    %17 = arith.extui %16 : i1 to i32
    %c0_i32_11 = arith.constant 0 : i32
    %18 = arith.cmpi ne, %17, %c0_i32_11 : i32
    scf.if %18 {
      %c8_i32 = arith.constant 8 : i32
      %34 = arith.muli %arg1, %c8_i32 : i32
      %35 = tpu.iota {dimensions = array<i32: 0>} : vector<8x1xi32>
      %36 = vector.broadcast %34 : i32 to vector<8x1xi32>
      %37 = arith.addi %36, %35 : vector<8x1xi32>
      %c16_26 = arith.constant 16 : index
      %c0_27 = arith.constant 0 : index
      %38 = vector.load %arg8[%c16_26, %c0_27] : memref<24x16xf32, #tpu.memory_space<vmem>>, vector<8x16xf32>
      %c16_i32 = arith.constant 16 : i32
      %39 = vector.broadcast %c16_i32 : i32 to vector<8x1xi32>
      %40 = arith.cmpi slt, %37, %39 : vector<8x1xi32>
      %cst_28 = arith.constant 0.000000e+00 : f32
      %41 = vector.broadcast %cst_28 : f32 to vector<8x16xf32>
      %42 = vector.shape_cast %40 : vector<8x1xi1> to vector<8x1xi1>
      %43 = vector.broadcast %42 : vector<8x1xi1> to vector<8x16xi1>
      %44 = arith.select %43, %38, %41 : vector<8x16xi1>, vector<8x16xf32>
      %c16_29 = arith.constant 16 : index
      %c0_30 = arith.constant 0 : index
      %45 = vector.load %arg8[%c16_29, %c0_30] : memref<24x16xf32, #tpu.memory_space<vmem>>, vector<8x16xf32>
      tpu.vector_store %arg8[%c16_29, %c0_30], %44 {strides = array<i32>} : memref<24x16xf32, #tpu.memory_space<vmem>>, vector<8x16xf32>,
    } else {
    }
    %c15 = arith.constant 15 : index
    %c0_12 = arith.constant 0 : index
    %19 = vector.load %arg8[%c15, %c0_12] : memref<24x16xf32, #tpu.memory_space<vmem>>, vector<8x16xf32>
    %c0_13 = arith.constant 0 : index
    %c128 = arith.constant 128 : index
    %20 = vector.load %arg5[%c0_13, %c128] : memref<16x256xf32, #tpu.memory_space<vmem>>, vector<16x128xf32>
    %cst_14 = arith.constant dense<0.000000e+00> : vector<8x128xf32>
    %21 = tpu.matmul %19, %20, %cst_14 {dimension_numbers = #tpu.dot_dimension_numbers<[1], [0], [0], [1], [0, 0, 1, 1], [], []>, precision = #tpu.contract_precision<fp32>} : vector<8x16xf32>, vector<16x128xf32>, vector<8x128xf32> -> vector<8x128xf32>
    %c16_15 = arith.constant 16 : index
    %c0_16 = arith.constant 0 : index
    %22 = vector.load %arg8[%c16_15, %c0_16] : memref<24x16xf32, #tpu.memory_space<vmem>>, vector<8x16xf32>
    %c0_17 = arith.constant 0 : index
    %c0_18 = arith.constant 0 : index
    %23 = vector.load %arg5[%c0_17, %c0_18] : memref<16x256xf32, #tpu.memory_space<vmem>>, vector<16x128xf32>
    %cst_19 = arith.constant dense<0.000000e+00> : vector<8x128xf32>
    %24 = tpu.matmul %22, %23, %cst_19 {dimension_numbers = #tpu.dot_dimension_numbers<[1], [0], [0], [1], [0, 0, 1, 1], [], []>, precision = #tpu.contract_precision<fp32>} : vector<8x16xf32>, vector<16x128xf32>, vector<8x128xf32> -> vector<8x128xf32>
    %25 = arith.addf %21, %24 : vector<8x128xf32>
    %c0_20 = arith.constant 0 : index
    %c0_21 = arith.constant 0 : index
    %26 = vector.load %arg6[%c0_20, %c0_21] : memref<1x128xf32, #tpu.memory_space<vmem>>, vector<1x128xf32>
    %27 = vector.broadcast %26 : vector<1x128xf32> to vector<8x128xf32>
    %28 = arith.addf %25, %27 : vector<8x128xf32>
    %cst_22 = arith.constant 0.000000e+00 : f32
    %29 = vector.broadcast %cst_22 : f32 to vector<8x128xf32>
    %30 = arith.maximumf %28, %29 : vector<8x128xf32>
    %c0_23 = arith.constant 0 : index
    %c0_24 = arith.constant 0 : index
    %c0_25 = arith.constant 0 : index
    %31 = vector.load %arg7[%c0_23, %c0_24, %c0_25] : memref<1x8x128xf32, #tpu.memory_space<vmem>>, vector<1x8x128xf32>
    %32 = vector.shape_cast %31 : vector<1x8x128xf32> to vector<8x128xf32>
    %33 = vector.shape_cast %30 : vector<8x128xf32> to vector<1x8x128xf32>
    tpu.vector_store %arg7[%c0_23, %c0_24, %c0_25], %33 {strides = array<i32>} : memref<1x8x128xf32, #tpu.memory_space<vmem>>, vector<1x8x128xf32>,
    return
  }
  func.func @transform_0(%arg0: i32, %arg1: i32) -> (i32, i32, i32) {
    %c0_i32 = arith.constant 0 : i32
    %c0_i32_0 = arith.constant 0 : i32
    return %arg0, %arg1, %c0_i32 : i32, i32, i32
  }
  func.func @transform_1(%arg0: i32, %arg1: i32) -> (i32, i32) {
    %c0_i32 = arith.constant 0 : i32
    %c0_i32_0 = arith.constant 0 : i32
    %c0_i32_1 = arith.constant 0 : i32
    return %c0_i32, %c0_i32_0 : i32, i32
  }
  func.func @transform_2(%arg0: i32, %arg1: i32) -> (i32, i32) {
    %c0_i32 = arith.constant 0 : i32
    %c0_i32_0 = arith.constant 0 : i32
    %c0_i32_1 = arith.constant 0 : i32
    return %c0_i32, %c0_i32_0 : i32, i32
  }
  func.func @transform_3(%arg0: i32, %arg1: i32) -> (i32, i32) {
    %c0_i32 = arith.constant 0 : i32
    %c0_i32_0 = arith.constant 0 : i32
    %c0_i32_1 = arith.constant 0 : i32
    return %c0_i32, %c0_i32_0 : i32, i32
  }
  func.func @transform_4(%arg0: i32, %arg1: i32) -> (i32, i32) {
    %c0_i32 = arith.constant 0 : i32
    %c0_i32_0 = arith.constant 0 : i32
    %c0_i32_1 = arith.constant 0 : i32
    return %c0_i32, %c0_i32_0 : i32, i32
  }
  func.func @transform_5(%arg0: i32, %arg1: i32) -> (i32, i32, i32) {
    %c0_i32 = arith.constant 0 : i32
    %c0_i32_0 = arith.constant 0 : i32
    return %arg0, %arg1, %c0_i32 : i32, i32, i32
  }
}

module attributes {stable_mosaic.version = 11 : i64} {
  func.func @_decoder_kernel(%arg0: i32, %arg1: i32, %arg2: memref<1x8x16xf32, #tpu.memory_space<vmem>>, %arg3: memref<16x16xf32, #tpu.memory_space<vmem>>, %arg4: memref<1x16xf32, #tpu.memory_space<vmem>>, %arg5: memref<16x256xf32, #tpu.memory_space<vmem>>, %arg6: memref<1x128xf32, #tpu.memory_space<vmem>>, %arg7: memref<1x8x128xf32, #tpu.memory_space<vmem>>, %arg8: memref<24x16xf32, #tpu.memory_space<vmem>>) attributes {dimension_semantics = [#tpu.dimension_semantics<parallel>, #tpu.dimension_semantics<arbitrary>], iteration_bounds = array<i64: 2, 3>, scalar_prefetch = 0 : i64, scratch_operands = 1 : i64, tpu.core_type = #tpu.core_type<tc>, window_params = [{transform_indices = @transform_0, window_bounds = array<i64: 1, 8, 16>}, {pipeline_mode = #tpu.pipeline_mode<synchronous>, transform_indices = @transform_1, window_bounds = array<i64: 16, 16>}, {pipeline_mode = #tpu.pipeline_mode<synchronous>, transform_indices = @transform_2, window_bounds = array<i64: 1, 16>}, {pipeline_mode = #tpu.pipeline_mode<synchronous>, transform_indices = @transform_3, window_bounds = array<i64: 16, 256>}, {pipeline_mode = #tpu.pipeline_mode<synchronous>, transform_indices = @transform_4, window_bounds = array<i64: 1, 128>}, {transform_indices = @transform_5, window_bounds = array<i64: 1, 8, 128>}]} {
    %c0 = arith.constant 0 : index
    %c0_0 = arith.constant 0 : index
    %c0_1 = arith.constant 0 : index
    %0 = vector.load %arg2[%c0, %c0_0, %c0_1] : memref<1x8x16xf32, #tpu.memory_space<vmem>>, vector<1x8x16xf32>
    %1 = vector.shape_cast %0 : vector<1x8x16xf32> to vector<8x16xf32>
    %c0_2 = arith.constant 0 : index
    %c0_3 = arith.constant 0 : index
    %2 = vector.load %arg3[%c0_2, %c0_3] : memref<16x16xf32, #tpu.memory_space<vmem>>, vector<16x16xf32>
    %cst = arith.constant dense<0.000000e+00> : vector<8x16xf32>
    %3 = tpu.matmul %1, %2, %cst {dimension_numbers = #tpu.dot_dimension_numbers<[1], [0], [0], [1], [0, 0, 1, 1], [], []>, precision = #tpu.contract_precision<fp32>} : vector<8x16xf32>, vector<16x16xf32>, vector<8x16xf32> -> vector<8x16xf32>
    %c0_4 = arith.constant 0 : index
    %c0_5 = arith.constant 0 : index
    %4 = vector.load %arg4[%c0_4, %c0_5] : memref<1x16xf32, #tpu.memory_space<vmem>>, vector<1x16xf32>
    %5 = vector.broadcast %4 : vector<1x16xf32> to vector<8x16xf32>
    %6 = arith.addf %3, %5 : vector<8x16xf32>
    %cst_6 = arith.constant 0.000000e+00 : f32
    %7 = vector.broadcast %cst_6 : f32 to vector<8x16xf32>
    %8 = arith.maximumf %6, %7 : vector<8x16xf32>
    %c0_i32 = arith.constant 0 : i32
    %9 = arith.cmpi eq, %arg1, %c0_i32 : i32
    %10 = arith.extui %9 : i1 to i32
    %c0_i32_7 = arith.constant 0 : i32
    %11 = arith.cmpi ne, %10, %c0_i32_7 : i32
    scf.if %11 {
      %cst_26 = arith.constant 0.000000e+00 : f32
      %34 = vector.broadcast %cst_26 : f32 to vector<1x16xf32>
      %c15_27 = arith.constant 15 : index
      %c0_28 = arith.constant 0 : index
      %35 = vector.load %arg8[%c15_27, %c0_28] : memref<24x16xf32, #tpu.memory_space<vmem>>, vector<1x16xf32>
      tpu.vector_store %arg8[%c15_27, %c0_28], %34 {strides = array<i32>} : memref<24x16xf32, #tpu.memory_space<vmem>>, vector<1x16xf32>,
    } else {
    }
    %c0_i32_8 = arith.constant 0 : i32
    %12 = arith.cmpi sgt, %arg1, %c0_i32_8 : i32
    %13 = arith.extui %12 : i1 to i32
    %c0_i32_9 = arith.constant 0 : i32
    %14 = arith.cmpi ne, %13, %c0_i32_9 : i32
    scf.if %14 {
      %c23 = arith.constant 23 : index
      %c0_26 = arith.constant 0 : index
      %34 = vector.load %arg8[%c23, %c0_26] : memref<24x16xf32, #tpu.memory_space<vmem>>, vector<1x16xf32>
      %c15_27 = arith.constant 15 : index
      %c0_28 = arith.constant 0 : index
      %35 = vector.load %arg8[%c15_27, %c0_28] : memref<24x16xf32, #tpu.memory_space<vmem>>, vector<1x16xf32>
      tpu.vector_store %arg8[%c15_27, %c0_28], %34 {strides = array<i32>} : memref<24x16xf32, #tpu.memory_space<vmem>>, vector<1x16xf32>,
    } else {
    }
    %c16 = arith.constant 16 : index
    %c0_10 = arith.constant 0 : index
    %15 = vector.load %arg8[%c16, %c0_10] : memref<24x16xf32, #tpu.memory_space<vmem>>, vector<8x16xf32>
    tpu.vector_store %arg8[%c16, %c0_10], %8 {strides = array<i32>} : memref<24x16xf32, #tpu.memory_space<vmem>>, vector<8x16xf32>,
    %c2_i32 = arith.constant 2 : i32
    %16 = arith.cmpi sge, %arg1, %c2_i32 : i32
    %17 = arith.extui %16 : i1 to i32
    %c0_i32_11 = arith.constant 0 : i32
    %18 = arith.cmpi ne, %17, %c0_i32_11 : i32
    scf.if %18 {
      %c8_i32 = arith.constant 8 : i32
      %34 = arith.muli %arg1, %c8_i32 : i32
      %35 = tpu.iota {dimensions = array<i32: 0>} : vector<8x1xi32>
      %36 = vector.broadcast %34 : i32 to vector<8x1xi32>
      %37 = arith.addi %36, %35 : vector<8x1xi32>
      %c16_26 = arith.constant 16 : index
      %c0_27 = arith.constant 0 : index
      %38 = vector.load %arg8[%c16_26, %c0_27] : memref<24x16xf32, #tpu.memory_space<vmem>>, vector<8x16xf32>
      %c16_i32 = arith.constant 16 : i32
      %39 = vector.broadcast %c16_i32 : i32 to vector<8x1xi32>
      %40 = arith.cmpi slt, %37, %39 : vector<8x1xi32>
      %cst_28 = arith.constant 0.000000e+00 : f32
      %41 = vector.broadcast %cst_28 : f32 to vector<8x16xf32>
      %42 = vector.shape_cast %40 : vector<8x1xi1> to vector<8x1xi1>
      %43 = vector.broadcast %42 : vector<8x1xi1> to vector<8x16xi1>
      %44 = arith.select %43, %38, %41 : vector<8x16xi1>, vector<8x16xf32>
      %c16_29 = arith.constant 16 : index
      %c0_30 = arith.constant 0 : index
      %45 = vector.load %arg8[%c16_29, %c0_30] : memref<24x16xf32, #tpu.memory_space<vmem>>, vector<8x16xf32>
      tpu.vector_store %arg8[%c16_29, %c0_30], %44 {strides = array<i32>} : memref<24x16xf32, #tpu.memory_space<vmem>>, vector<8x16xf32>,
    } else {
    }
    %c15 = arith.constant 15 : index
    %c0_12 = arith.constant 0 : index
    %19 = vector.load %arg8[%c15, %c0_12] : memref<24x16xf32, #tpu.memory_space<vmem>>, vector<8x16xf32>
    %c0_13 = arith.constant 0 : index
    %c128 = arith.constant 128 : index
    %20 = vector.load %arg5[%c0_13, %c128] : memref<16x256xf32, #tpu.memory_space<vmem>>, vector<16x128xf32>
    %cst_14 = arith.constant dense<0.000000e+00> : vector<8x128xf32>
    %21 = tpu.matmul %19, %20, %cst_14 {dimension_numbers = #tpu.dot_dimension_numbers<[1], [0], [0], [1], [0, 0, 1, 1], [], []>, precision = #tpu.contract_precision<fp32>} : vector<8x16xf32>, vector<16x128xf32>, vector<8x128xf32> -> vector<8x128xf32>
    %c16_15 = arith.constant 16 : index
    %c0_16 = arith.constant 0 : index
    %22 = vector.load %arg8[%c16_15, %c0_16] : memref<24x16xf32, #tpu.memory_space<vmem>>, vector<8x16xf32>
    %c0_17 = arith.constant 0 : index
    %c0_18 = arith.constant 0 : index
    %23 = vector.load %arg5[%c0_17, %c0_18] : memref<16x256xf32, #tpu.memory_space<vmem>>, vector<16x128xf32>
    %cst_19 = arith.constant dense<0.000000e+00> : vector<8x128xf32>
    %24 = tpu.matmul %22, %23, %cst_19 {dimension_numbers = #tpu.dot_dimension_numbers<[1], [0], [0], [1], [0, 0, 1, 1], [], []>, precision = #tpu.contract_precision<fp32>} : vector<8x16xf32>, vector<16x128xf32>, vector<8x128xf32> -> vector<8x128xf32>
    %25 = arith.addf %21, %24 : vector<8x128xf32>
    %c0_20 = arith.constant 0 : index
    %c0_21 = arith.constant 0 : index
    %26 = vector.load %arg6[%c0_20, %c0_21] : memref<1x128xf32, #tpu.memory_space<vmem>>, vector<1x128xf32>
    %27 = vector.broadcast %26 : vector<1x128xf32> to vector<8x128xf32>
    %28 = arith.addf %25, %27 : vector<8x128xf32>
    %cst_22 = arith.constant 0.000000e+00 : f32
    %29 = vector.broadcast %cst_22 : f32 to vector<8x128xf32>
    %30 = arith.maximumf %28, %29 : vector<8x128xf32>
    %c0_23 = arith.constant 0 : index
    %c0_24 = arith.constant 0 : index
    %c0_25 = arith.constant 0 : index
    %31 = vector.load %arg7[%c0_23, %c0_24, %c0_25] : memref<1x8x128xf32, #tpu.memory_space<vmem>>, vector<1x8x128xf32>
    %32 = vector.shape_cast %31 : vector<1x8x128xf32> to vector<8x128xf32>
    %33 = vector.shape_cast %30 : vector<8x128xf32> to vector<1x8x128xf32>
    tpu.vector_store %arg7[%c0_23, %c0_24, %c0_25], %33 {strides = array<i32>} : memref<1x8x128xf32, #tpu.memory_space<vmem>>, vector<1x8x128xf32>,
    return
  }
  func.func @transform_0(%arg0: i32, %arg1: i32) -> (i32, i32, i32) {
    %c0_i32 = arith.constant 0 : i32
    %c0_i32_0 = arith.constant 0 : i32
    return %arg0, %arg1, %c0_i32 : i32, i32, i32
  }
  func.func @transform_1(%arg0: i32, %arg1: i32) -> (i32, i32) {
    %c0_i32 = arith.constant 0 : i32
    %c0_i32_0 = arith.constant 0 : i32
    %c0_i32_1 = arith.constant 0 : i32
    return %c0_i32, %c0_i32_0 : i32, i32
  }
  func.func @transform_2(%arg0: i32, %arg1: i32) -> (i32, i32) {
    %c0_i32 = arith.constant 0 : i32
    %c0_i32_0 = arith.constant 0 : i32
    %c0_i32_1 = arith.constant 0 : i32
    return %c0_i32, %c0_i32_0 : i32, i32
  }
  func.func @transform_3(%arg0: i32, %arg1: i32) -> (i32, i32) {
    %c0_i32 = arith.constant 0 : i32
    %c0_i32_0 = arith.constant 0 : i32
    %c0_i32_1 = arith.constant 0 : i32
    return %c0_i32, %c0_i32_0 : i32, i32
  }
  func.func @transform_4(%arg0: i32, %arg1: i32) -> (i32, i32) {
    %c0_i32 = arith.constant 0 : i32
    %c0_i32_0 = arith.constant 0 : i32
    %c0_i32_1 = arith.constant 0 : i32
    return %c0_i32, %c0_i32_0 : i32, i32
  }
  func.func @transform_5(%arg0: i32, %arg1: i32) -> (i32, i32, i32) {
    %c0_i32 = arith.constant 0 : i32
    %c0_i32_0 = arith.constant 0 : i32
    return %arg0, %arg1, %c0_i32 : i32, i32, i32
  }
}

</mosaic_0001>

<bundles_post_ra>
// kernel: tpu_custom_call.1
= control target key start
LH: loop header
LB: loop body
LE: loop exit
PB: predicated region body
PF: predicated region fallthrough
CT: control target
= control target key end

     0   :  { %10 = vsyncpa [#allocation4], 0  ;;  %s2515_s0 = inlined_call_operand.vmem [shape: f32[2,24,16], index: 0, kind: input, shape index: {}]   ;;  %s2516_s1 = inlined_call_operand.vmem [shape: f32[16,16], index: 1, kind: input, shape index: {}]   ;;  %s2517_s2 = inlined_call_operand.vmem [shape: f32[1,16], index: 2, kind: input, shape index: {}]   ;;  %s2518_s3 = inlined_call_operand.vmem [shape: f32[16,256], index: 3, kind: input, shape index: {}]   ;;  %s2519_s4 = inlined_call_operand.vmem [shape: f32[1,128], index: 4, kind: input, shape index: {}]   ;;  %s2520_s5 = inlined_call_operand.hbm [shape: f32[2,24,128], index: 5, kind: output, shape index: {}]  }
   0x1   :  { %12 = vsyncpa [#allocation4 + $0x1], 0  ;;  %s2255_s18 = smov 0   ;;  %s2257_s19 = smov 0  }
   0x2   :  { %s2259_s20 = smov 0   ;;  %s2261_s21 = smov 0  }
   0x3   :  { %s2263_s22 = smov 0   ;;  %s2265_s23 = smov 0  }
   0x4   :  { %s2267_s24 = smov 0   ;;  %s2269_s25 = smov 0  }
   0x5 LB: > { %s1785_s26 = sadd.s32 4294967295, %s2218_s25   ;;  %s1786_s27 = sadd.s32 4294967294, %s2218_s25   ;;  %s2218_s25 = sphi %s2269_s25, %s18_s25   ;;  %s2214_s24 = sphi %s2267_s24, %s2529_s24   ;;  %s2210_s23 = sphi %s2265_s23, %s2528_s23   ;;  %s2206_s22 = sphi %s2263_s22, %s2527_s22   ;;  %s2202_s21 = sphi %s2261_s21, %s2526_s21   ;;  %s2198_s20 = sphi %s2259_s20, %s2525_s20   ;;  %s2194_s19 = sphi %s2257_s19, %s2524_s19   ;;  %s2190_s18 = sphi %s2255_s18, %s2523_s18  }
   0x6   : > { %s27_s28 = sadd.s32 1, %s2210_s23  ;;  %s30_s29 = sadd.s32 1, %s2214_s24 }
   0x7   : > { %p28_p0 = scmp.ge.s32.totalorder %s27_s28, 3  ;;  %p161_p1 = scmp.ne.s32.totalorder %s2198_s20, %s2194_s19 }
   0x8   : > { %p162_p2 = scmp.eq.s32.totalorder %s1785_s26, 5  ;;  %p167_p5 = scmp.ne.s32.totalorder %s2194_s19, %s2190_s18 }
   0x9   : > { %s2531_s28 = smov (%p28_p0, %s27_s28), 0  ;;  %s2533_s29 = smov (!%p28_p0, %s30_s29), %s2214_s24 }
   0xa   : > { %s147_s30 = ssub.s32 %s2210_s23, %s2531_s28  ;;  %p2306_p3 = por %p162_p2, %p161_p1 }
   0xb   : > { %p32_p4 = scmp.ge.s32.totalorder %s2533_s29, 2  ;;  %p168_p6 = scmp.eq.s32.totalorder %s1786_s27, 5 }
   0xc   : > { %p1789_p7 = scmp.ge.s32.totalorder %s2218_s25, 1  ;;  %p209_p9 = scmp.lt.s32.totalorder %s2218_s25, 7 }
   0xd   : > { %s2535_s29 = smov (%p32_p4, %s2533_s29), 0  ;;  %p2315_p8 = por %p168_p6, %p167_p5 }
   0xe   : > { %s146_s8 = ssub.s32 %s2214_s24, %s2535_s29  ;;  %s151_s9 = sadd.s32 1, %s2198_s20 }
   0xf   : > { %s148_s10 = sor.u32 %s147_s30, %s146_s8  ;;  %p210_p10 = pnand %p1789_p7, %p209_p9 }
  0x10   : > { %p149_p11 = scmp.eq.s32.totalorder %s148_s10, 0  ;;  %s237_s12 = sand.u32 (!%p210_p10), 1, %s2194_s19   ;;  %v249_v0 = vld [vmem:[%s2516_s1] sm:$0xff] (!%p210_p10)  ;;  %v250_v1 = vld [vmem:[%s2516_s1 + $0x8] sm:$0xff] (!%p210_p10)  ;;  %v2220_v2 = vmov (!%p210_p10), 0.0|0.0   ;;  %vm2221_vm0 = vmmov (!%p210_p10), 0  }
  0x11   : > { %213 = sbr.rel (%p210_p10) target bundleno = 599 (0x257), region = 40  ;;  %s2335_s17 = sshll.u32 (!%p210_p10), %s237_s12, 3  ;;  %1982 = vmatprep.subr.bf16.mxu0 (!%p210_p10), %v2220_v2  ;;  %v263_v3 = vand.u32 (!%p210_p10), 4294901760, %v249_v0  ;;  %v266_v4 = vand.u32 (!%p210_p10), 4294901760, %v250_v1  ;;  %v2222_v5 = vmov (!%p210_p10), 0.0   ;;  %vm258_vm1 = vcmask (!%p210_p10), 130048  }
  0x12   : > { %s2324_s11 = scalar_select %p149_p11, %s2198_s20, %s151_s9  }
  0x13   : > { %1860 = vmatprep.mubr.msk.f32.mxu0 (!%p210_p10), %vm2221_vm0, %v2222_v5  ;;  %p240_p12 = scmp.lt.s32.totalorder (!%p210_p10), %s2206_s22, 1  ;;  %p242_p13 = scmp.lt.s32.totalorder (!%p210_p10), %s2202_s21, 2  ;;  %v1983_v6 = vpack.c.bf16 (!%p210_p10), %v266_v4, %v263_v3  ;;  %v341_v7 = vsub.f32 (!%p210_p10), %v249_v0, %v263_v3  ;;  %v348_v8 = vsub.f32 (!%p210_p10), %v250_v1, %v266_v4  ;;  %v1792_v25 = vld [vmem:[%s2517_s2] ss:$0 sm:$0xff] (!%p210_p10) }
  0x14   : > { %p1793_p0 = scmp.ne.s32.totalorder (!%p210_p10), %s2202_s21, 0 }
  0x15   : > { %1984 = vmatpush3.bf16.msra.mxu0 (!%p210_p10), %v1983_v6  ;;  %v342_v9 = vand.u32 (!%p210_p10), 4294901760, %v341_v7  ;;  %v349_v10 = vand.u32 (!%p210_p10), 4294901760, %v348_v8  ;;  %v1989_v23 = vpack.c.bf16 (!%p210_p10), %v348_v8, %v341_v7 }
  0x16   : > { %1985 = vmatprep.subr.bf16.mxu0 (!%p210_p10), %v2220_v2 }
  0x17   : > { %v343_v13 = vsub.f32 (!%p210_p10), %v341_v7, %v342_v9  ;;  %v350_v14 = vsub.f32 (!%p210_p10), %v348_v8, %v349_v10  ;;  %v1995_v24 = vpack.c.bf16 (!%p210_p10), %v349_v10, %v342_v9 }
  0x18   : > { %s241_s26 = scalar_select %p240_p12, %s2206_s22, 1 }
  0x19   : > { %s243_s27 = scalar_select %p242_p13, %s2202_s21, 2  ;;  %v344_v17 = vand.u32 4294901760, %v343_v13  ;;  %v351_v18 = vand.u32 4294901760, %v350_v14 }
  0x1a   : > { %s2047_s30 = smul.u32 3, %s241_s26  ;;  %s239_s26 = scalar_lea.vmem [#allocation3], %s2335_s17  ;;  %vm726_vm2 = vcmask (!%p1793_p0), 122880   ;;  %v2223_v30 = vmov (!%p1793_p0), 0.0  }
  0x1b   : > { %v1986_v21 = vpack.c.bf16 %v351_v18, %v344_v17  ;;  %727 = vst.msk [vmem:[#allocation2 + $0xf] sm:$0x1] (!%p1793_p0), %vm726_vm2, %v2223_v30 }
  0x1c   : > { %s245_s8 = sadd.s32 %s2047_s30, %s243_s27 }
  0x1d   : > { %s1791_s9 = sshll.u32 %s245_s8, 3 }
  0x1e   : > { %s247_s14 = scalar_lea.vmem %s2515_s0, %s1791_s9 }
  0x1f   : > { %v248_v11 = vld [vmem:[%s247_s14] sm:$0xff] }
  0x20   : > { %v260_v12 = vsel %vm258_vm1, %v248_v11, 0 }
  0x21   : > { %v329_v15 = vand.u32 4294901760, %v260_v12 }
  0x23   : > { %v330_v16 = vsub.f32 %v260_v12, %v329_v15 }
  0x25   : > { %v331_v19 = vand.u32 4294901760, %v330_v16 }
  0x27   : > { %v332_v20 = vsub.f32 %v330_v16, %v331_v19 }
  0x29   : > { %v333_v22 = vand.u32 4294901760, %v332_v20 }
  0x2b   : > { %1861 = vmatmul.mubr.f32.vlgmr.msra.gmra.mrb[0].mxu0 %v333_v22 }
  0x2c   : > { %1987 = vmatpush3.bf16.msra.mxu0 %v1986_v21  ;;  %1867 = vmatprep.mubr.msk.f32.mxu0 %vm2221_vm0, %v2222_v5 }
  0x2d   : > { %1988 = vmatprep.subr.bf16.mxu0 %v2220_v2 }
  0x33   : > { %1868 = vmatmul.mubr.f32.vlgmr.msra.gmra.mrb[0].mxu0 %v329_v15 }
  0x34   : > { %1990 = vmatpush3.bf16.msra.mxu0 %v1989_v23  ;;  %1874 = vmatprep.mubr.msk.f32.mxu0 %vm2221_vm0, %v2222_v5 }
  0x35   : > { %1991 = vmatprep.subr.bf16.mxu0 %v2220_v2 }
  0x3b   : > { %1875 = vmatmul.mubr.f32.vlgmr.msra.gmra.mrb[0].mxu0 %v330_v16 }
  0x3c   : > { %1993 = vmatpush3.bf16.msra.mxu0 %v1983_v6  ;;  %1881 = vmatprep.mubr.msk.f32.mxu0 %vm2221_vm0, %v2222_v5 }
  0x3d   : > { %1994 = vmatprep.subr.bf16.mxu0 %v2220_v2 }
  0x43   : > { %1882 = vmatmul.mubr.f32.vlgmr.msra.gmra.mrb[0].mxu0 %v331_v19 }
  0x44   : > { %1996 = vmatpush3.bf16.msra.mxu0 %v1995_v24  ;;  %1888 = vmatprep.mubr.msk.f32.mxu0 %vm2221_vm0, %v2222_v5 }
  0x45   : > { %1997 = vmatprep.subr.bf16.mxu0 %v2220_v2 }
  0x4b   : > { %1889 = vmatmul.mubr.f32.vlgmr.msra.gmra.mrb[0].mxu0 %v329_v15 }
  0x4c   : > { %1999 = vmatpush3.bf16.msra.mxu0 %v1983_v6  ;;  %1895 = vmatprep.mubr.msk.f32.mxu0 %vm2221_vm0, %v2222_v5 }
  0x53   : > { %1896 = vmatmul.mubr.f32.vlgmr.msra.gmra.mrb[0].mxu0 %v329_v15 }
 0x123   : > { %725 = sbr.rel (%p1793_p0) target bundleno = 298 (0x12a), region = 44 }
 0x126   : > { %v717_v26 = vpop.f32.mrb[0].mxu0 }
 0x127   : > { %v2036_v27 = vadd.f32 %v1792_v25, %v717_v26  ;;  %v1897_v28 = vpop.f32.mrb[1].mxu0 }
 0x129   : > { %v721_v29 = vmax.f32 %v2036_v27, 0.0 }
 0x12a PF: > { %p1794_p1 = scmp.le.s32.totalorder %s2202_s21, 0 }
 0x12b   : > { %v732_v31 = vld [vmem:[#allocation2 + $0x17] sm:$0x1] (!%p1794_p1)  ;;  %vm733_vm3 = vcmask (!%p1794_p1), 122880  }
 0x12c   : > { %731 = sbr.rel (%p1794_p1) target bundleno = 307 (0x133), region = 48  ;;  %734 = vst.msk [vmem:[#allocation2 + $0xf] sm:$0x1] (!%p1794_p1), %vm733_vm3, %v732_v31 }
 0x133 PF: > { %735 = vst.msk [vmem:[#allocation2 + $0x10] sm:$0xff] %vm258_vm1, %v721_v29  ;;  %739 = sbr.rel (%p242_p13) target bundleno = 317 (0x13d), region = 52  ;;  %s1796_s27 = sshll.u32 (!%p242_p13), %s2202_s21, 3  ;;  %v741_v32 = vlaneseq (!%p242_p13) }
 0x134   : > { %v743_v33 = vstv (!%p242_p13), %s1796_s27 }
 0x135   : > { %v742_v34 = vshrl.u32 (!%p242_p13), %v741_v32, 7 }
 0x137   : > { %v744_v35 = vadd.s32 (!%p242_p13), %v743_v33, %v742_v34 }
 0x139   : > { %vm746_vm4 = vcmp.lt.s32.totalorder (!%p242_p13), %v744_v35, 16 }
 0x13a   : > { %v745_v36 = vld [vmem:[#allocation2 + $0x10] sm:$0xff] }
 0x13b   : > { %v749_v37 = vsel %vm746_vm4, %v745_v36, 0.0 }
 0x13c   : > { %750 = vst.msk [vmem:[#allocation2 + $0x10] sm:$0xff] %vm258_vm1, %v749_v37 }
 0x13d PF: > { %2000 = vmatprep.subr.bf16.mxu1 %v2220_v2  ;;  %v755_v38 = vld [vmem:[%s2518_s3] sm:$0xff]  ;;  %v756_v39 = vld [vmem:[%s2518_s3 + $0x10] sm:$0xff]  ;;  %1902 = vmatprep.mubr.msk.f32.mxu1 %vm2221_vm0, %v2222_v5  ;;  %v752_v44 = vld [vmem:[%s2518_s3 + $0x8] sm:$0xff]  ;;  %s2048_s27 = smul.u32 3, %s2206_s22  ;;  %s1707_s13 = sshll.u32 %s239_s26, 4  ;;  %s2460_s13 = int_to_ptr.vmem [resolvable:$true] %s1707_s13 }
 0x13e   : > { %v761_v41 = vand.u32 4294901760, %v755_v38  ;;  %v764_v42 = vand.u32 4294901760, %v756_v39  ;;  %2018 = vmatprep.subr.bf16.mxu0 %v2220_v2  ;;  %v753_v45 = vld [vmem:[%s2518_s3 + $0x18] sm:$0xff]  ;;  %1944 = vmatprep.mubr.msk.f32.mxu0 %vm2221_vm0, %v2222_v5  ;;  %v1223_v48 = vand.u32 4294901760, %v752_v44  ;;  %s2124_s16 = scalar_lea.vmem %s2460_s13, 128 }
 0x13f   : > { %v1226_v49 = vand.u32 4294901760, %v753_v45  ;;  %s1703_s30 = sadd.s32 %s2202_s21, %s2048_s27  ;;  %s1692_s21 = scalar_lea.sflag [#allocation4], %s237_s12 }
 0x140   : > { %v2001_v51 = vpack.c.bf16 %v764_v42, %v761_v41  ;;  %v839_v52 = vsub.f32 %v755_v38, %v761_v41  ;;  %v846_v53 = vsub.f32 %v756_v39, %v764_v42  ;;  %v1301_v1 = vsub.f32 %v752_v44, %v1223_v48  ;;  %s1799_s10 = sshll.u32 %s1703_s30, 7  ;;  %p2125_p2 = scmp.ne.s32.totalorder %s2460_s13, %s2124_s16 }
 0x141   : > { %v2401_v56 = vpack.c.bf16 %v1226_v49, %v1223_v48  ;;  %v1308_v6 = vsub.f32 %v753_v45, %v1226_v49  ;;  %s2458_s15 = scalar_lea.hbm %s2520_s5, %s1799_s10  ;;  %s2224_s27 = smov [#allocation3]  }
 0x142   : > { %2002 = vmatpush3.bf16.msra.mxu1 %v2001_v51  ;;  %v840_v57 = vand.u32 4294901760, %v839_v52  ;;  %v847_v58 = vand.u32 4294901760, %v846_v53  ;;  %v2007_v12 = vpack.c.bf16 %v846_v53, %v839_v52  ;;  %v1302_v13 = vand.u32 4294901760, %v1301_v1  ;;  %p2126_p4 = pnand %p2125_p2, %p2306_p3  ;;  %s2128_s30 = sshll.u32 %s2224_s27, 4  ;;  %s2129_s30 = int_to_ptr.vmem [resolvable:$false] %s2128_s30 }
 0x143   : > { %v754_v40 = vld [vmem:[#allocation2 + $0x10] sm:$0xff]  ;;  %2003 = vmatprep.subr.bf16.mxu1 %v2220_v2  ;;  %2020 = vmatpush3.bf16.msra.mxu0 %v2401_v56  ;;  %v2025_v11 = vpack.c.bf16 %v1308_v6, %v1301_v1  ;;  %v1309_v14 = vand.u32 4294901760, %v1308_v6  ;;  %s2130_s8 = scalar_lea.vmem %s2129_s30, 256  ;;  %p2131_p6 = scmp.lt.s32.totalorder %s2460_s13, %s2129_s30 }
 0x144   : > { %v758_v43 = vsel %vm258_vm1, %v754_v40, 0  ;;  %v751_v46 = vld [vmem:[#allocation2 + $0xf] sm:$0xff]  ;;  %v841_v61 = vsub.f32 %v839_v52, %v840_v57  ;;  %v848_v62 = vsub.f32 %v846_v53, %v847_v58  ;;  %2024 = vmatprep.subr.bf16.mxu0 %v2220_v2  ;;  %v2013_v16 = vpack.c.bf16 %v847_v58, %v840_v57  ;;  %v1797_v53 = vld [vmem:[%s2519_s4] ss:$0 sm:$0xff]  ;;  %p2127_p5 = pneg %p2126_p4  ;;  %p2132_p7 = scmp.lt.s32.totalorder %s2130_s8, %s2124_s16 }
 0x145   : > { %v2395_v47 = vand.u32 4294901760, %v758_v43  ;;  %v1220_v50 = vsel %vm258_vm1, %v751_v46, 0  ;;  %v2031_v15 = vpack.c.bf16 %v1309_v14, %v1302_v13  ;;  %v1303_v17 = vsub.f32 %v1301_v1, %v1302_v13 }
 0x146   : > { %v2398_v54 = vand.u32 4294901760, %v1220_v50  ;;  %v842_v3 = vand.u32 4294901760, %v841_v61  ;;  %v849_v4 = vand.u32 4294901760, %v848_v62  ;;  %v1310_v18 = vsub.f32 %v1308_v6, %v1309_v14  ;;  %p2133_p9 = por %p2132_p7, %p2131_p6 }
 0x147   : > { %v828_v55 = vsub.f32 %v758_v43, %v2395_v47  ;;  %v1304_v19 = vand.u32 4294901760, %v1303_v17 }
 0x148   : > { %v2404_v59 = vsub.f32 %v1220_v50, %v2398_v54  ;;  %v2004_v9 = vpack.c.bf16 %v849_v4, %v842_v3  ;;  %v1311_v20 = vand.u32 4294901760, %v1310_v18  ;;  %p2134_p10 = pnand %p2133_p9, %p2127_p5 }
 0x149   : > { %v829_v60 = vand.u32 4294901760, %v828_v55 }
 0x14a   : > { %v1291_v63 = vand.u32 4294901760, %v2404_v59  ;;  %v2022_v21 = vpack.c.bf16 %v1311_v20, %v1304_v19 }
 0x14b   : > { %v830_v0 = vsub.f32 %v828_v55, %v829_v60 }
 0x14c   : > { %v1292_v7 = vsub.f32 %v2404_v59, %v1291_v63 }
 0x14d   : > { %v831_v8 = vand.u32 4294901760, %v830_v0 }
 0x14e   : > { %v1293_v10 = vand.u32 4294901760, %v1292_v7 }
 0x14f   : > { %1903 = vmatmul.mubr.f32.vlgmr.msra.gmra.mrb[0].mxu1 %v831_v8 }
 0x150   : > { %2005 = vmatpush3.bf16.msra.mxu1 %v2004_v9  ;;  %1909 = vmatprep.mubr.msk.f32.mxu1 %vm2221_vm0, %v2222_v5 }
 0x151   : > { %2006 = vmatprep.subr.bf16.mxu1 %v2220_v2  ;;  %1945 = vmatmul.mubr.f32.vlgmr.msra.gmra.mrb[2].mxu0 %v1293_v10 }
 0x152   : > { %2026 = vmatpush3.bf16.msra.mxu0 %v2025_v11  ;;  %1958 = vmatprep.mubr.msk.f32.mxu0 %vm2221_vm0, %v2222_v5 }
 0x153   : > { %1910 = vmatmul.mubr.f32.vlgmr.msra.gmra.mrb[2].mxu1 %v2395_v47  ;;  %2030 = vmatprep.subr.bf16.mxu0 %v2220_v2 }
 0x154   : > { %2008 = vmatpush3.bf16.msra.mxu1 %v2007_v12  ;;  %1916 = vmatprep.mubr.msk.f32.mxu1 %vm2221_vm0, %v2222_v5 }
 0x155   : > { %2009 = vmatprep.subr.bf16.mxu1 %v2220_v2  ;;  %1959 = vmatmul.mubr.f32.vlgmr.msra.gmra.mrb[4].mxu0 %v2404_v59 }
 0x156   : > { %2032 = vmatpush3.bf16.msra.mxu0 %v2031_v15  ;;  %1972 = vmatprep.mubr.msk.f32.mxu0 %vm2221_vm0, %v2222_v5 }
 0x157   : > { %1917 = vmatmul.mubr.f32.vlgmr.msra.gmra.mrb[4].mxu1 %v828_v55 }
 0x158   : > { %2011 = vmatpush3.bf16.msra.mxu1 %v2001_v51  ;;  %1923 = vmatprep.mubr.msk.f32.mxu1 %vm2221_vm0, %v2222_v5 }
 0x159   : > { %2012 = vmatprep.subr.bf16.mxu1 %v2220_v2  ;;  %1973 = vmatmul.mubr.f32.vlgmr.msra.gmra.mrb[6].mxu0 %v2398_v54 }
 0x15b   : > { %1924 = vmatmul.mubr.f32.vlgmr.msra.gmra.mrb[6].mxu1 %v829_v60 }
 0x15c   : > { %2014 = vmatpush3.bf16.msra.mxu1 %v2013_v16  ;;  %1930 = vmatprep.mubr.msk.f32.mxu1 %vm2221_vm0, %v2222_v5 }
 0x15d   : > { %2015 = vmatprep.subr.bf16.mxu1 %v2220_v2 }
 0x15f   : > { %1931 = vmatmul.mubr.f32.vlgmr.msra.gmra.mrb[8].mxu1 %v2395_v47 }
 0x160   : > { %2017 = vmatpush3.bf16.msra.mxu1 %v2001_v51  ;;  %1937 = vmatprep.mubr.msk.f32.mxu1 %vm2221_vm0, %v2222_v5 }
 0x161   : > { %2021 = vmatprep.subr.bf16.mxu1 %v2220_v2 }
 0x163   : > { %1938 = vmatmul.mubr.f32.vlgmr.msra.gmra.mrb[10].mxu1 %v2395_v47 }
 0x164   : > { %2023 = vmatpush3.bf16.msra.mxu1 %v2022_v21  ;;  %1951 = vmatprep.mubr.msk.f32.mxu1 %vm2221_vm0, %v2222_v5 }
 0x165   : > { %2027 = vmatprep.subr.bf16.mxu1 %v2220_v2 }
 0x167   : > { %1952 = vmatmul.mubr.f32.vlgmr.msra.gmra.mrb[12].mxu1 %v2398_v54 }
 0x168   : > { %2029 = vmatpush3.bf16.msra.mxu1 %v2401_v56  ;;  %1965 = vmatprep.mubr.msk.f32.mxu1 %vm2221_vm0, %v2222_v5 }
 0x169   : > { %2033 = vmatprep.subr.bf16.mxu1 %v2220_v2 }
 0x16b   : > { %1966 = vmatmul.mubr.f32.vlgmr.msra.gmra.mrb[14].mxu1 %v1291_v63 }
 0x16c   : > { %2035 = vmatpush3.bf16.msra.mxu1 %v2401_v56  ;;  %1979 = vmatprep.mubr.msk.f32.mxu1 %vm2221_vm0, %v2222_v5 }
 0x16f   : > { %1980 = vmatmul.mubr.f32.vlgmr.msra.gmra.mrb[16].mxu1 %v2398_v54 }
 0x222   : > { %v833_v22 = vpop.f32.mrb[0].mxu1 }
 0x223   : > { %v1904_v23 = vpop.f32.mrb[1].mxu1 }
 0x224   : > { %v1295_v24 = vpop.f32.mrb[2].mxu0 }
 0x225   : > { %v1946_v25 = vpop.f32.mrb[3].mxu0 }
 0x226   : > { %v914_v26 = vpop.f32.mrb[2].mxu1 }
 0x227   : > { %v915_v27 = vadd.f32 %v914_v26, %v833_v22  ;;  %v1911_v28 = vpop.f32.mrb[3].mxu1 }
 0x228   : > { %v1452_v29 = vpop.f32.mrb[4].mxu0 }
 0x229   : > { %v1960_v30 = vpop.f32.mrb[5].mxu0 }
 0x22a   : > { %v990_v31 = vpop.f32.mrb[4].mxu1 }
 0x22b   : > { %v991_v32 = vadd.f32 %v990_v31, %v915_v27  ;;  %v1918_v2 = vpop.f32.mrb[5].mxu1 }
 0x22c   : > { %v1604_v33 = vpop.f32.mrb[6].mxu0 }
 0x22d   : > { %v1974_v34 = vpop.f32.mrb[7].mxu0 }
 0x22e   : > { %v1065_v35 = vpop.f32.mrb[6].mxu1 }
 0x22f   : > { %v1066_v36 = vadd.f32 %v1065_v35, %v991_v32  ;;  %v1925_v5 = vpop.f32.mrb[7].mxu1 }
 0x232   : > { %v1142_v37 = vpop.f32.mrb[8].mxu1 }
 0x233   : > { %v1143_v38 = vadd.f32 %v1142_v37, %v1066_v36  ;;  %v1932_v39 = vpop.f32.mrb[9].mxu1 }
 0x236   : > { %v1215_v40 = vpop.f32.mrb[10].mxu1 }
 0x237   : > { %v1216_v41 = vadd.f32 %v1215_v40, %v1143_v38  ;;  %v1939_v42 = vpop.f32.mrb[11].mxu1 }
 0x239   : > { %v1296_v43 = vadd.f32 %v1295_v24, %v1216_v41 }
 0x23a   : > { %v1376_v44 = vpop.f32.mrb[12].mxu1 }
 0x23b   : > { %v1377_v45 = vadd.f32 %v1376_v44, %v1296_v43  ;;  %v1953_v46 = vpop.f32.mrb[13].mxu1 }
 0x23d   : > { %v1453_v47 = vadd.f32 %v1452_v29, %v1377_v45 }
 0x23e   : > { %v1527_v48 = vpop.f32.mrb[14].mxu1 }
 0x23f   : > { %v1528_v49 = vadd.f32 %v1527_v48, %v1453_v47  ;;  %v1967_v50 = vpop.f32.mrb[15].mxu1 }
 0x241   : > { %v1605_v51 = vadd.f32 %v1604_v33, %v1528_v49 }
 0x242   : > { %v1677_v52 = vpop.f32.mrb[16].mxu1 }
 0x243   : > { %v1678_v54 = vadd.f32 %v1677_v52, %v1605_v51  ;;  %v1981_v55 = vpop.f32.mrb[17].mxu1 }
 0x245   : > { %v1688_v56 = vadd.f32 %v1797_v53, %v1678_v54 }
 0x247   : > { %v1689_v57 = vmax.f32 %v1688_v56, 0.0 }
 0x249   : > { %1690 = vst [vmem:[%s239_s26] sm:$0xff] %v1689_v57 }
 0x24a   : > { %2137 = shalt.err (!%p2134_p10)
}
 0x24b   : > { %s2138_s12 = scalar_lea.hbm %s2458_s15, 128  ;;  %s2142_s9 = scalar_lea.hbm %s2520_s5, 768 }
 0x24c   : > { %p2139_p11 = scmp.ne.s32.totalorder %s2458_s15, %s2138_s12  ;;  %p2143_p0 = scmp.lt.u32.totalorder %s2458_s15, %s2520_s5 }
 0x24d   : > { %p2144_p1 = scmp.lt.u32.totalorder %s2142_s9, %s2138_s12  ;;  %p2146_p4 = scmp.lt.u32.totalorder %s2138_s12, %s2458_s15 }
 0x24e   : > { %p2140_p12 = pnand %p2139_p11, %p2306_p3 }
 0x24f   : > { %p2145_p2 = por %p2144_p1, %p2143_p0 }
 0x250   : > { %p2141_p13 = pneg %p2140_p12 }
 0x251   : > { %p2147_p5 = por %p2146_p4, %p2145_p2 }
 0x253   : > { %p2148_p6 = pnand %p2147_p5, %p2141_p13 }
 0x255   : > { %2151 = shalt.err (!%p2148_p6)
}
 0x256   : > { %2049 = dma.vmem_to_hbm [thread:$0]  (%p2306_p3), %s2460_s13, 128, %s2458_s15, %s1692_s21  }
 0x257 PF: > { %p2055_p7 = scmp.ge.s32.totalorder %s2218_s25, 2  ;;  %s1719_s14 = sand.u32 1, %s2190_s18  }
 0x258   : > { %s1720_s16 = scalar_lea.sflag [#allocation4], %s1719_s14 }
 0x259   : > { %p2052_p9 = pnand %p2055_p7, %p2315_p8 }
 0x25b   : > { %2185 = dma.done.wait (!%p2052_p9), %s1720_s16, 128  }
 0x25c   : > { %2187 = vsyncadd (!%p2052_p9), %s1720_s16, 4294967168  ;;  %s18_s25 = sadd.s32 1, %s2218_s25   ;;  %s2523_s18 = smov %s2194_s19 }
 0x25d   : > { %p15_p10 = scmp.ge.s32.totalorder %s18_s25, 8   ;;  %s2524_s19 = smov %s2198_s20 }
 0x25e   : > { %s2525_s20 = smov %s2324_s11  ;;  %s2526_s21 = smov %s2210_s23 }
 0x25f   : > { %s2527_s22 = smov %s2214_s24  ;;  %s2528_s23 = smov %s2531_s28 }
 0x260   : > { %s2529_s24 = smov %s2535_s29  ;;  %17 = sbr.rel (!%p15_p10) target bundleno = 5 (0x5), region = 87 }
 0x267   :  { %1725 = vsyncpa [#allocation4], 1 }
 0x268   :  { %1727 = vsyncpa [#allocation4 + $0x1], 1 }

// kernel: tpu_custom_call.1
= control target key start
LH: loop header
LB: loop body
LE: loop exit
PB: predicated region body
PF: predicated region fallthrough
CT: control target
= control target key end

     0   :  { %10 = vsyncpa [#allocation4], 0  ;;  %s2515_s0 = inlined_call_operand.vmem [shape: f32[2,24,16], index: 0, kind: input, shape index: {}]   ;;  %s2516_s1 = inlined_call_operand.vmem [shape: f32[16,16], index: 1, kind: input, shape index: {}]   ;;  %s2517_s2 = inlined_call_operand.vmem [shape: f32[1,16], index: 2, kind: input, shape index: {}]   ;;  %s2518_s3 = inlined_call_operand.vmem [shape: f32[16,256], index: 3, kind: input, shape index: {}]   ;;  %s2519_s4 = inlined_call_operand.vmem [shape: f32[1,128], index: 4, kind: input, shape index: {}]   ;;  %s2520_s5 = inlined_call_operand.hbm [shape: f32[2,24,128], index: 5, kind: output, shape index: {}]  }
   0x1   :  { %12 = vsyncpa [#allocation4 + $0x1], 0  ;;  %s2255_s18 = smov 0   ;;  %s2257_s19 = smov 0  }
   0x2   :  { %s2259_s20 = smov 0   ;;  %s2261_s21 = smov 0  }
   0x3   :  { %s2263_s22 = smov 0   ;;  %s2265_s23 = smov 0  }
   0x4   :  { %s2267_s24 = smov 0   ;;  %s2269_s25 = smov 0  }
   0x5 LB: > { %s1785_s26 = sadd.s32 4294967295, %s2218_s25   ;;  %s1786_s27 = sadd.s32 4294967294, %s2218_s25   ;;  %s2218_s25 = sphi %s2269_s25, %s18_s25   ;;  %s2214_s24 = sphi %s2267_s24, %s2529_s24   ;;  %s2210_s23 = sphi %s2265_s23, %s2528_s23   ;;  %s2206_s22 = sphi %s2263_s22, %s2527_s22   ;;  %s2202_s21 = sphi %s2261_s21, %s2526_s21   ;;  %s2198_s20 = sphi %s2259_s20, %s2525_s20   ;;  %s2194_s19 = sphi %s2257_s19, %s2524_s19   ;;  %s2190_s18 = sphi %s2255_s18, %s2523_s18  }
   0x6   : > { %s27_s28 = sadd.s32 1, %s2210_s23  ;;  %s30_s29 = sadd.s32 1, %s2214_s24 }
   0x7   : > { %p28_p0 = scmp.ge.s32.totalorder %s27_s28, 3  ;;  %p161_p1 = scmp.ne.s32.totalorder %s2198_s20, %s2194_s19 }
   0x8   : > { %p162_p2 = scmp.eq.s32.totalorder %s1785_s26, 5  ;;  %p167_p5 = scmp.ne.s32.totalorder %s2194_s19, %s2190_s18 }
   0x9   : > { %s2531_s28 = smov (%p28_p0, %s27_s28), 0  ;;  %s2533_s29 = smov (!%p28_p0, %s30_s29), %s2214_s24 }
   0xa   : > { %s147_s30 = ssub.s32 %s2210_s23, %s2531_s28  ;;  %p2306_p3 = por %p162_p2, %p161_p1 }
   0xb   : > { %p32_p4 = scmp.ge.s32.totalorder %s2533_s29, 2  ;;  %p168_p6 = scmp.eq.s32.totalorder %s1786_s27, 5 }
   0xc   : > { %p1789_p7 = scmp.ge.s32.totalorder %s2218_s25, 1  ;;  %p209_p9 = scmp.lt.s32.totalorder %s2218_s25, 7 }
   0xd   : > { %s2535_s29 = smov (%p32_p4, %s2533_s29), 0  ;;  %p2315_p8 = por %p168_p6, %p167_p5 }
   0xe   : > { %s146_s8 = ssub.s32 %s2214_s24, %s2535_s29  ;;  %s151_s9 = sadd.s32 1, %s2198_s20 }
   0xf   : > { %s148_s10 = sor.u32 %s147_s30, %s146_s8  ;;  %p210_p10 = pnand %p1789_p7, %p209_p9 }
  0x10   : > { %p149_p11 = scmp.eq.s32.totalorder %s148_s10, 0  ;;  %s237_s12 = sand.u32 (!%p210_p10), 1, %s2194_s19   ;;  %v249_v0 = vld [vmem:[%s2516_s1] sm:$0xff] (!%p210_p10)  ;;  %v250_v1 = vld [vmem:[%s2516_s1 + $0x8] sm:$0xff] (!%p210_p10)  ;;  %v2220_v2 = vmov (!%p210_p10), 0.0|0.0   ;;  %vm2221_vm0 = vmmov (!%p210_p10), 0  }
  0x11   : > { %213 = sbr.rel (%p210_p10) target bundleno = 599 (0x257), region = 40  ;;  %s2335_s17 = sshll.u32 (!%p210_p10), %s237_s12, 3  ;;  %1982 = vmatprep.subr.bf16.mxu0 (!%p210_p10), %v2220_v2  ;;  %v263_v3 = vand.u32 (!%p210_p10), 4294901760, %v249_v0  ;;  %v266_v4 = vand.u32 (!%p210_p10), 4294901760, %v250_v1  ;;  %v2222_v5 = vmov (!%p210_p10), 0.0   ;;  %vm258_vm1 = vcmask (!%p210_p10), 130048  }
  0x12   : > { %s2324_s11 = scalar_select %p149_p11, %s2198_s20, %s151_s9  }
  0x13   : > { %1860 = vmatprep.mubr.msk.f32.mxu0 (!%p210_p10), %vm2221_vm0, %v2222_v5  ;;  %p240_p12 = scmp.lt.s32.totalorder (!%p210_p10), %s2206_s22, 1  ;;  %p242_p13 = scmp.lt.s32.totalorder (!%p210_p10), %s2202_s21, 2  ;;  %v1983_v6 = vpack.c.bf16 (!%p210_p10), %v266_v4, %v263_v3  ;;  %v341_v7 = vsub.f32 (!%p210_p10), %v249_v0, %v263_v3  ;;  %v348_v8 = vsub.f32 (!%p210_p10), %v250_v1, %v266_v4  ;;  %v1792_v25 = vld [vmem:[%s2517_s2] ss:$0 sm:$0xff] (!%p210_p10) }
  0x14   : > { %p1793_p0 = scmp.ne.s32.totalorder (!%p210_p10), %s2202_s21, 0 }
  0x15   : > { %1984 = vmatpush3.bf16.msra.mxu0 (!%p210_p10), %v1983_v6  ;;  %v342_v9 = vand.u32 (!%p210_p10), 4294901760, %v341_v7  ;;  %v349_v10 = vand.u32 (!%p210_p10), 4294901760, %v348_v8  ;;  %v1989_v23 = vpack.c.bf16 (!%p210_p10), %v348_v8, %v341_v7 }
  0x16   : > { %1985 = vmatprep.subr.bf16.mxu0 (!%p210_p10), %v2220_v2 }
  0x17   : > { %v343_v13 = vsub.f32 (!%p210_p10), %v341_v7, %v342_v9  ;;  %v350_v14 = vsub.f32 (!%p210_p10), %v348_v8, %v349_v10  ;;  %v1995_v24 = vpack.c.bf16 (!%p210_p10), %v349_v10, %v342_v9 }
  0x18   : > { %s241_s26 = scalar_select %p240_p12, %s2206_s22, 1 }
  0x19   : > { %s243_s27 = scalar_select %p242_p13, %s2202_s21, 2  ;;  %v344_v17 = vand.u32 4294901760, %v343_v13  ;;  %v351_v18 = vand.u32 4294901760, %v350_v14 }
  0x1a   : > { %s2047_s30 = smul.u32 3, %s241_s26  ;;  %s239_s26 = scalar_lea.vmem [#allocation3], %s2335_s17  ;;  %vm726_vm2 = vcmask (!%p1793_p0), 122880   ;;  %v2223_v30 = vmov (!%p1793_p0), 0.0  }
  0x1b   : > { %v1986_v21 = vpack.c.bf16 %v351_v18, %v344_v17  ;;  %727 = vst.msk [vmem:[#allocation2 + $0xf] sm:$0x1] (!%p1793_p0), %vm726_vm2, %v2223_v30 }
  0x1c   : > { %s245_s8 = sadd.s32 %s2047_s30, %s243_s27 }
  0x1d   : > { %s1791_s9 = sshll.u32 %s245_s8, 3 }
  0x1e   : > { %s247_s14 = scalar_lea.vmem %s2515_s0, %s1791_s9 }
  0x1f   : > { %v248_v11 = vld [vmem:[%s247_s14] sm:$0xff] }
  0x20   : > { %v260_v12 = vsel %vm258_vm1, %v248_v11, 0 }
  0x21   : > { %v329_v15 = vand.u32 4294901760, %v260_v12 }
  0x23   : > { %v330_v16 = vsub.f32 %v260_v12, %v329_v15 }
  0x25   : > { %v331_v19 = vand.u32 4294901760, %v330_v16 }
  0x27   : > { %v332_v20 = vsub.f32 %v330_v16, %v331_v19 }
  0x29   : > { %v333_v22 = vand.u32 4294901760, %v332_v20 }
  0x2b   : > { %1861 = vmatmul.mubr.f32.vlgmr.msra.gmra.mrb[0].mxu0 %v333_v22 }
  0x2c   : > { %1987 = vmatpush3.bf16.msra.mxu0 %v1986_v21  ;;  %1867 = vmatprep.mubr.msk.f32.mxu0 %vm2221_vm0, %v2222_v5 }
  0x2d   : > { %1988 = vmatprep.subr.bf16.mxu0 %v2220_v2 }
  0x33   : > { %1868 = vmatmul.mubr.f32.vlgmr.msra.gmra.mrb[0].mxu0 %v329_v15 }
  0x34   : > { %1990 = vmatpush3.bf16.msra.mxu0 %v1989_v23  ;;  %1874 = vmatprep.mubr.msk.f32.mxu0 %vm2221_vm0, %v2222_v5 }
  0x35   : > { %1991 = vmatprep.subr.bf16.mxu0 %v2220_v2 }
  0x3b   : > { %1875 = vmatmul.mubr.f32.vlgmr.msra.gmra.mrb[0].mxu0 %v330_v16 }
  0x3c   : > { %1993 = vmatpush3.bf16.msra.mxu0 %v1983_v6  ;;  %1881 = vmatprep.mubr.msk.f32.mxu0 %vm2221_vm0, %v2222_v5 }
  0x3d   : > { %1994 = vmatprep.subr.bf16.mxu0 %v2220_v2 }
  0x43   : > { %1882 = vmatmul.mubr.f32.vlgmr.msra.gmra.mrb[0].mxu0 %v331_v19 }
  0x44   : > { %1996 = vmatpush3.bf16.msra.mxu0 %v1995_v24  ;;  %1888 = vmatprep.mubr.msk.f32.mxu0 %vm2221_vm0, %v2222_v5 }
  0x45   : > { %1997 = vmatprep.subr.bf16.mxu0 %v2220_v2 }
  0x4b   : > { %1889 = vmatmul.mubr.f32.vlgmr.msra.gmra.mrb[0].mxu0 %v329_v15 }
  0x4c   : > { %1999 = vmatpush3.bf16.msra.mxu0 %v1983_v6  ;;  %1895 = vmatprep.mubr.msk.f32.mxu0 %vm2221_vm0, %v2222_v5 }
  0x53   : > { %1896 = vmatmul.mubr.f32.vlgmr.msra.gmra.mrb[0].mxu0 %v329_v15 }
 0x123   : > { %725 = sbr.rel (%p1793_p0) target bundleno = 298 (0x12a), region = 44 }
 0x126   : > { %v717_v26 = vpop.f32.mrb[0].mxu0 }
 0x127   : > { %v2036_v27 = vadd.f32 %v1792_v25, %v717_v26  ;;  %v1897_v28 = vpop.f32.mrb[1].mxu0 }
 0x129   : > { %v721_v29 = vmax.f32 %v2036_v27, 0.0 }
 0x12a PF: > { %p1794_p1 = scmp.le.s32.totalorder %s2202_s21, 0 }
 0x12b   : > { %v732_v31 = vld [vmem:[#allocation2 + $0x17] sm:$0x1] (!%p1794_p1)  ;;  %vm733_vm3 = vcmask (!%p1794_p1), 122880  }
 0x12c   : > { %731 = sbr.rel (%p1794_p1) target bundleno = 307 (0x133), region = 48  ;;  %734 = vst.msk [vmem:[#allocation2 + $0xf] sm:$0x1] (!%p1794_p1), %vm733_vm3, %v732_v31 }
 0x133 PF: > { %735 = vst.msk [vmem:[#allocation2 + $0x10] sm:$0xff] %vm258_vm1, %v721_v29  ;;  %739 = sbr.rel (%p242_p13) target bundleno = 317 (0x13d), region = 52  ;;  %s1796_s27 = sshll.u32 (!%p242_p13), %s2202_s21, 3  ;;  %v741_v32 = vlaneseq (!%p242_p13) }
 0x134   : > { %v743_v33 = vstv (!%p242_p13), %s1796_s27 }
 0x135   : > { %v742_v34 = vshrl.u32 (!%p242_p13), %v741_v32, 7 }
 0x137   : > { %v744_v35 = vadd.s32 (!%p242_p13), %v743_v33, %v742_v34 }
 0x139   : > { %vm746_vm4 = vcmp.lt.s32.totalorder (!%p242_p13), %v744_v35, 16 }
 0x13a   : > { %v745_v36 = vld [vmem:[#allocation2 + $0x10] sm:$0xff] }
 0x13b   : > { %v749_v37 = vsel %vm746_vm4, %v745_v36, 0.0 }
 0x13c   : > { %750 = vst.msk [vmem:[#allocation2 + $0x10] sm:$0xff] %vm258_vm1, %v749_v37 }
 0x13d PF: > { %2000 = vmatprep.subr.bf16.mxu1 %v2220_v2  ;;  %v755_v38 = vld [vmem:[%s2518_s3] sm:$0xff]  ;;  %v756_v39 = vld [vmem:[%s2518_s3 + $0x10] sm:$0xff]  ;;  %1902 = vmatprep.mubr.msk.f32.mxu1 %vm2221_vm0, %v2222_v5  ;;  %v752_v44 = vld [vmem:[%s2518_s3 + $0x8] sm:$0xff]  ;;  %s2048_s27 = smul.u32 3, %s2206_s22  ;;  %s1707_s13 = sshll.u32 %s239_s26, 4  ;;  %s2460_s13 = int_to_ptr.vmem [resolvable:$true] %s1707_s13 }
 0x13e   : > { %v761_v41 = vand.u32 4294901760, %v755_v38  ;;  %v764_v42 = vand.u32 4294901760, %v756_v39  ;;  %2018 = vmatprep.subr.bf16.mxu0 %v2220_v2  ;;  %v753_v45 = vld [vmem:[%s2518_s3 + $0x18] sm:$0xff]  ;;  %1944 = vmatprep.mubr.msk.f32.mxu0 %vm2221_vm0, %v2222_v5  ;;  %v1223_v48 = vand.u32 4294901760, %v752_v44  ;;  %s2124_s16 = scalar_lea.vmem %s2460_s13, 128 }
 0x13f   : > { %v1226_v49 = vand.u32 4294901760, %v753_v45  ;;  %s1703_s30 = sadd.s32 %s2202_s21, %s2048_s27  ;;  %s1692_s21 = scalar_lea.sflag [#allocation4], %s237_s12 }
 0x140   : > { %v2001_v51 = vpack.c.bf16 %v764_v42, %v761_v41  ;;  %v839_v52 = vsub.f32 %v755_v38, %v761_v41  ;;  %v846_v53 = vsub.f32 %v756_v39, %v764_v42  ;;  %v1301_v1 = vsub.f32 %v752_v44, %v1223_v48  ;;  %s1799_s10 = sshll.u32 %s1703_s30, 7  ;;  %p2125_p2 = scmp.ne.s32.totalorder %s2460_s13, %s2124_s16 }
 0x141   : > { %v2401_v56 = vpack.c.bf16 %v1226_v49, %v1223_v48  ;;  %v1308_v6 = vsub.f32 %v753_v45, %v1226_v49  ;;  %s2458_s15 = scalar_lea.hbm %s2520_s5, %s1799_s10  ;;  %s2224_s27 = smov [#allocation3]  }
 0x142   : > { %2002 = vmatpush3.bf16.msra.mxu1 %v2001_v51  ;;  %v840_v57 = vand.u32 4294901760, %v839_v52  ;;  %v847_v58 = vand.u32 4294901760, %v846_v53  ;;  %v2007_v12 = vpack.c.bf16 %v846_v53, %v839_v52  ;;  %v1302_v13 = vand.u32 4294901760, %v1301_v1  ;;  %p2126_p4 = pnand %p2125_p2, %p2306_p3  ;;  %s2128_s30 = sshll.u32 %s2224_s27, 4  ;;  %s2129_s30 = int_to_ptr.vmem [resolvable:$false] %s2128_s30 }
 0x143   : > { %v754_v40 = vld [vmem:[#allocation2 + $0x10] sm:$0xff]  ;;  %2003 = vmatprep.subr.bf16.mxu1 %v2220_v2  ;;  %2020 = vmatpush3.bf16.msra.mxu0 %v2401_v56  ;;  %v2025_v11 = vpack.c.bf16 %v1308_v6, %v1301_v1  ;;  %v1309_v14 = vand.u32 4294901760, %v1308_v6  ;;  %s2130_s8 = scalar_lea.vmem %s2129_s30, 256  ;;  %p2131_p6 = scmp.lt.s32.totalorder %s2460_s13, %s2129_s30 }
 0x144   : > { %v758_v43 = vsel %vm258_vm1, %v754_v40, 0  ;;  %v751_v46 = vld [vmem:[#allocation2 + $0xf] sm:$0xff]  ;;  %v841_v61 = vsub.f32 %v839_v52, %v840_v57  ;;  %v848_v62 = vsub.f32 %v846_v53, %v847_v58  ;;  %2024 = vmatprep.subr.bf16.mxu0 %v2220_v2  ;;  %v2013_v16 = vpack.c.bf16 %v847_v58, %v840_v57  ;;  %v1797_v53 = vld [vmem:[%s2519_s4] ss:$0 sm:$0xff]  ;;  %p2127_p5 = pneg %p2126_p4  ;;  %p2132_p7 = scmp.lt.s32.totalorder %s2130_s8, %s2124_s16 }
 0x145   : > { %v2395_v47 = vand.u32 4294901760, %v758_v43  ;;  %v1220_v50 = vsel %vm258_vm1, %v751_v46, 0  ;;  %v2031_v15 = vpack.c.bf16 %v1309_v14, %v1302_v13  ;;  %v1303_v17 = vsub.f32 %v1301_v1, %v1302_v13 }
 0x146   : > { %v2398_v54 = vand.u32 4294901760, %v1220_v50  ;;  %v842_v3 = vand.u32 4294901760, %v841_v61  ;;  %v849_v4 = vand.u32 4294901760, %v848_v62  ;;  %v1310_v18 = vsub.f32 %v1308_v6, %v1309_v14  ;;  %p2133_p9 = por %p2132_p7, %p2131_p6 }
 0x147   : > { %v828_v55 = vsub.f32 %v758_v43, %v2395_v47  ;;  %v1304_v19 = vand.u32 4294901760, %v1303_v17 }
 0x148   : > { %v2404_v59 = vsub.f32 %v1220_v50, %v2398_v54  ;;  %v2004_v9 = vpack.c.bf16 %v849_v4, %v842_v3  ;;  %v1311_v20 = vand.u32 4294901760, %v1310_v18  ;;  %p2134_p10 = pnand %p2133_p9, %p2127_p5 }
 0x149   : > { %v829_v60 = vand.u32 4294901760, %v828_v55 }
 0x14a   : > { %v1291_v63 = vand.u32 4294901760, %v2404_v59  ;;  %v2022_v21 = vpack.c.bf16 %v1311_v20, %v1304_v19 }
 0x14b   : > { %v830_v0 = vsub.f32 %v828_v55, %v829_v60 }
 0x14c   : > { %v1292_v7 = vsub.f32 %v2404_v59, %v1291_v63 }
 0x14d   : > { %v831_v8 = vand.u32 4294901760, %v830_v0 }
 0x14e   : > { %v1293_v10 = vand.u32 4294901760, %v1292_v7 }
 0x14f   : > { %1903 = vmatmul.mubr.f32.vlgmr.msra.gmra.mrb[0].mxu1 %v831_v8 }
 0x150   : > { %2005 = vmatpush3.bf16.msra.mxu1 %v2004_v9  ;;  %1909 = vmatprep.mubr.msk.f32.mxu1 %vm2221_vm0, %v2222_v5 }
 0x151   : > { %2006 = vmatprep.subr.bf16.mxu1 %v2220_v2  ;;  %1945 = vmatmul.mubr.f32.vlgmr.msra.gmra.mrb[2].mxu0 %v1293_v10 }
 0x152   : > { %2026 = vmatpush3.bf16.msra.mxu0 %v2025_v11  ;;  %1958 = vmatprep.mubr.msk.f32.mxu0 %vm2221_vm0, %v2222_v5 }
 0x153   : > { %1910 = vmatmul.mubr.f32.vlgmr.msra.gmra.mrb[2].mxu1 %v2395_v47  ;;  %2030 = vmatprep.subr.bf16.mxu0 %v2220_v2 }
 0x154   : > { %2008 = vmatpush3.bf16.msra.mxu1 %v2007_v12  ;;  %1916 = vmatprep.mubr.msk.f32.mxu1 %vm2221_vm0, %v2222_v5 }
 0x155   : > { %2009 = vmatprep.subr.bf16.mxu1 %v2220_v2  ;;  %1959 = vmatmul.mubr.f32.vlgmr.msra.gmra.mrb[4].mxu0 %v2404_v59 }
 0x156   : > { %2032 = vmatpush3.bf16.msra.mxu0 %v2031_v15  ;;  %1972 = vmatprep.mubr.msk.f32.mxu0 %vm2221_vm0, %v2222_v5 }
 0x157   : > { %1917 = vmatmul.mubr.f32.vlgmr.msra.gmra.mrb[4].mxu1 %v828_v55 }
 0x158   : > { %2011 = vmatpush3.bf16.msra.mxu1 %v2001_v51  ;;  %1923 = vmatprep.mubr.msk.f32.mxu1 %vm2221_vm0, %v2222_v5 }
 0x159   : > { %2012 = vmatprep.subr.bf16.mxu1 %v2220_v2  ;;  %1973 = vmatmul.mubr.f32.vlgmr.msra.gmra.mrb[6].mxu0 %v2398_v54 }
 0x15b   : > { %1924 = vmatmul.mubr.f32.vlgmr.msra.gmra.mrb[6].mxu1 %v829_v60 }
 0x15c   : > { %2014 = vmatpush3.bf16.msra.mxu1 %v2013_v16  ;;  %1930 = vmatprep.mubr.msk.f32.mxu1 %vm2221_vm0, %v2222_v5 }
 0x15d   : > { %2015 = vmatprep.subr.bf16.mxu1 %v2220_v2 }
 0x15f   : > { %1931 = vmatmul.mubr.f32.vlgmr.msra.gmra.mrb[8].mxu1 %v2395_v47 }
 0x160   : > { %2017 = vmatpush3.bf16.msra.mxu1 %v2001_v51  ;;  %1937 = vmatprep.mubr.msk.f32.mxu1 %vm2221_vm0, %v2222_v5 }
 0x161   : > { %2021 = vmatprep.subr.bf16.mxu1 %v2220_v2 }
 0x163   : > { %1938 = vmatmul.mubr.f32.vlgmr.msra.gmra.mrb[10].mxu1 %v2395_v47 }
 0x164   : > { %2023 = vmatpush3.bf16.msra.mxu1 %v2022_v21  ;;  %1951 = vmatprep.mubr.msk.f32.mxu1 %vm2221_vm0, %v2222_v5 }
 0x165   : > { %2027 = vmatprep.subr.bf16.mxu1 %v2220_v2 }
 0x167   : > { %1952 = vmatmul.mubr.f32.vlgmr.msra.gmra.mrb[12].mxu1 %v2398_v54 }
 0x168   : > { %2029 = vmatpush3.bf16.msra.mxu1 %v2401_v56  ;;  %1965 = vmatprep.mubr.msk.f32.mxu1 %vm2221_vm0, %v2222_v5 }
 0x169   : > { %2033 = vmatprep.subr.bf16.mxu1 %v2220_v2 }
 0x16b   : > { %1966 = vmatmul.mubr.f32.vlgmr.msra.gmra.mrb[14].mxu1 %v1291_v63 }
 0x16c   : > { %2035 = vmatpush3.bf16.msra.mxu1 %v2401_v56  ;;  %1979 = vmatprep.mubr.msk.f32.mxu1 %vm2221_vm0, %v2222_v5 }
 0x16f   : > { %1980 = vmatmul.mubr.f32.vlgmr.msra.gmra.mrb[16].mxu1 %v2398_v54 }
 0x222   : > { %v833_v22 = vpop.f32.mrb[0].mxu1 }
 0x223   : > { %v1904_v23 = vpop.f32.mrb[1].mxu1 }
 0x224   : > { %v1295_v24 = vpop.f32.mrb[2].mxu0 }
 0x225   : > { %v1946_v25 = vpop.f32.mrb[3].mxu0 }
 0x226   : > { %v914_v26 = vpop.f32.mrb[2].mxu1 }
 0x227   : > { %v915_v27 = vadd.f32 %v914_v26, %v833_v22  ;;  %v1911_v28 = vpop.f32.mrb[3].mxu1 }
 0x228   : > { %v1452_v29 = vpop.f32.mrb[4].mxu0 }
 0x229   : > { %v1960_v30 = vpop.f32.mrb[5].mxu0 }
 0x22a   : > { %v990_v31 = vpop.f32.mrb[4].mxu1 }
 0x22b   : > { %v991_v32 = vadd.f32 %v990_v31, %v915_v27  ;;  %v1918_v2 = vpop.f32.mrb[5].mxu1 }
 0x22c   : > { %v1604_v33 = vpop.f32.mrb[6].mxu0 }
 0x22d   : > { %v1974_v34 = vpop.f32.mrb[7].mxu0 }
 0x22e   : > { %v1065_v35 = vpop.f32.mrb[6].mxu1 }
 0x22f   : > { %v1066_v36 = vadd.f32 %v1065_v35, %v991_v32  ;;  %v1925_v5 = vpop.f32.mrb[7].mxu1 }
 0x232   : > { %v1142_v37 = vpop.f32.mrb[8].mxu1 }
 0x233   : > { %v1143_v38 = vadd.f32 %v1142_v37, %v1066_v36  ;;  %v1932_v39 = vpop.f32.mrb[9].mxu1 }
 0x236   : > { %v1215_v40 = vpop.f32.mrb[10].mxu1 }
 0x237   : > { %v1216_v41 = vadd.f32 %v1215_v40, %v1143_v38  ;;  %v1939_v42 = vpop.f32.mrb[11].mxu1 }
 0x239   : > { %v1296_v43 = vadd.f32 %v1295_v24, %v1216_v41 }
 0x23a   : > { %v1376_v44 = vpop.f32.mrb[12].mxu1 }
 0x23b   : > { %v1377_v45 = vadd.f32 %v1376_v44, %v1296_v43  ;;  %v1953_v46 = vpop.f32.mrb[13].mxu1 }
 0x23d   : > { %v1453_v47 = vadd.f32 %v1452_v29, %v1377_v45 }
 0x23e   : > { %v1527_v48 = vpop.f32.mrb[14].mxu1 }
 0x23f   : > { %v1528_v49 = vadd.f32 %v1527_v48, %v1453_v47  ;;  %v1967_v50 = vpop.f32.mrb[15].mxu1 }
 0x241   : > { %v1605_v51 = vadd.f32 %v1604_v33, %v1528_v49 }
 0x242   : > { %v1677_v52 = vpop.f32.mrb[16].mxu1 }
 0x243   : > { %v1678_v54 = vadd.f32 %v1677_v52, %v1605_v51  ;;  %v1981_v55 = vpop.f32.mrb[17].mxu1 }
 0x245   : > { %v1688_v56 = vadd.f32 %v1797_v53, %v1678_v54 }
 0x247   : > { %v1689_v57 = vmax.f32 %v1688_v56, 0.0 }
 0x249   : > { %1690 = vst [vmem:[%s239_s26] sm:$0xff] %v1689_v57 }
 0x24a   : > { %2137 = shalt.err (!%p2134_p10)
}
 0x24b   : > { %s2138_s12 = scalar_lea.hbm %s2458_s15, 128  ;;  %s2142_s9 = scalar_lea.hbm %s2520_s5, 768 }
 0x24c   : > { %p2139_p11 = scmp.ne.s32.totalorder %s2458_s15, %s2138_s12  ;;  %p2143_p0 = scmp.lt.u32.totalorder %s2458_s15, %s2520_s5 }
 0x24d   : > { %p2144_p1 = scmp.lt.u32.totalorder %s2142_s9, %s2138_s12  ;;  %p2146_p4 = scmp.lt.u32.totalorder %s2138_s12, %s2458_s15 }
 0x24e   : > { %p2140_p12 = pnand %p2139_p11, %p2306_p3 }
 0x24f   : > { %p2145_p2 = por %p2144_p1, %p2143_p0 }
 0x250   : > { %p2141_p13 = pneg %p2140_p12 }
 0x251   : > { %p2147_p5 = por %p2146_p4, %p2145_p2 }
 0x253   : > { %p2148_p6 = pnand %p2147_p5, %p2141_p13 }
 0x255   : > { %2151 = shalt.err (!%p2148_p6)
}
 0x256   : > { %2049 = dma.vmem_to_hbm [thread:$0]  (%p2306_p3), %s2460_s13, 128, %s2458_s15, %s1692_s21  }
 0x257 PF: > { %p2055_p7 = scmp.ge.s32.totalorder %s2218_s25, 2  ;;  %s1719_s14 = sand.u32 1, %s2190_s18  }
 0x258   : > { %s1720_s16 = scalar_lea.sflag [#allocation4], %s1719_s14 }
 0x259   : > { %p2052_p9 = pnand %p2055_p7, %p2315_p8 }
 0x25b   : > { %2185 = dma.done.wait (!%p2052_p9), %s1720_s16, 128  }
 0x25c   : > { %2187 = vsyncadd (!%p2052_p9), %s1720_s16, 4294967168  ;;  %s18_s25 = sadd.s32 1, %s2218_s25   ;;  %s2523_s18 = smov %s2194_s19 }
 0x25d   : > { %p15_p10 = scmp.ge.s32.totalorder %s18_s25, 8   ;;  %s2524_s19 = smov %s2198_s20 }
 0x25e   : > { %s2525_s20 = smov %s2324_s11  ;;  %s2526_s21 = smov %s2210_s23 }
 0x25f   : > { %s2527_s22 = smov %s2214_s24  ;;  %s2528_s23 = smov %s2531_s28 }
 0x260   : > { %s2529_s24 = smov %s2535_s29  ;;  %17 = sbr.rel (!%p15_p10) target bundleno = 5 (0x5), region = 87 }
 0x267   :  { %1725 = vsyncpa [#allocation4], 1 }
 0x268   :  { %1727 = vsyncpa [#allocation4 + $0x1], 1 }

</bundles_post_ra>
